<compile_context>
chip_gen: v7x
topology: tpu7x:2x2x1
jax: 0.10.0
libtpu: 0.0.40
codegen_flags: <defaults>
</compile_context>

<pallas_src>
import functools

import jax
import jax.numpy as jnp
from jax.experimental import pallas as pl
from jax.experimental.pallas import tpu as pltpu


# ----------------------------------------------------------------------------
# Pallas kernel: fused 3x3 conv (same padding) + bias + LeakyReLU(0.1), NHWC
# ----------------------------------------------------------------------------

def _conv3x3_lrelu_kernel(x_ref, w_ref, b_ref, o_ref, *, H, W, G0, G, neg_slope):
    """x_ref: (1, H+2, W+2, G0) spatially pre-padded image (NHWC)
       w_ref: (9, G0, G)        conv taps, k = ky*3 + kx
       b_ref: (1, G)            bias
       o_ref: (1, H, W, G)      LeakyReLU(conv(x) + b)
    """
    x = x_ref[0]                                           # (H+2, W+2, G0)
    acc = jnp.zeros((H * W, G), jnp.float32)
    # Static unroll over the 9 taps: 9 shifted matmuls on the MXU.
    for ky in range(3):
        for kx in range(3):
            patch = x[ky:ky + H, kx:kx + W, :].reshape(H * W, G0)
            acc = acc + jnp.dot(patch, w_ref[ky * 3 + kx],
                                preferred_element_type=jnp.float32)
    acc = acc + b_ref[...]                                 # broadcast (1, G)
    acc = jnp.where(acc >= 0.0, acc, neg_slope * acc)      # LeakyReLU(0.1)
    o_ref[0] = acc.reshape(H, W, G)


def one_conv_forward(params, x, *, neg_slope=0.1):
    """x: (B, G0, H, W) float32 (NCHW, PyTorch layout).
    Returns (B, G0 + G, H, W) = cat(x, LeakyReLU(conv3x3(x) + b), dim=1)."""
    w, b = params["w"], params["b"]                        # (G, G0, 3, 3), (G,)
    B, G0, H, W = x.shape
    G = w.shape[0]

    x = x.astype(jnp.float32)
    x_nhwc = jnp.transpose(x, (0, 2, 3, 1))                      # (B, H, W, G0)
    x_pad = jnp.pad(x_nhwc, ((0, 0), (1, 1), (1, 1), (0, 0)))    # "same" padding
    # (G, G0, 3, 3) OIHW  ->  (9, G0, G) with taps ordered k = ky*3 + kx
    w_k = jnp.transpose(w, (2, 3, 1, 0)).reshape(9, G0, G).astype(jnp.float32)
    b2 = b.reshape(1, G).astype(jnp.float32)

    y_nhwc = pl.pallas_call(
        functools.partial(_conv3x3_lrelu_kernel,
                          H=H, W=W, G0=G0, G=G, neg_slope=neg_slope),
        out_shape=jax.ShapeDtypeStruct((B, H, W, G), jnp.float32),
        grid=(B,),
        in_specs=[
            pl.BlockSpec((1, H + 2, W + 2, G0), lambda i: (i, 0, 0, 0)),
            pl.BlockSpec((9, G0, G), lambda i: (0, 0, 0)),   # VMEM-resident
            pl.BlockSpec((1, G), lambda i: (0, 0)),          # VMEM-resident
        ],
        out_specs=pl.BlockSpec((1, H, W, G), lambda i: (i, 0, 0, 0)),
        compiler_params=pltpu.CompilerParams(
            dimension_semantics=("parallel",)),
    )(x_pad, w_k, b2)

    y = jnp.transpose(y_nhwc, (0, 3, 1, 2))                      # (B, G, H, W)
    # TODO(synk): channel-dim concat stays in XLA glue; Mosaic minor-dim
    # concatenation / lane-offset stores are too restrictive to fuse it safely.
    return jnp.concatenate([x, y], axis=1)


# ----------------------------------------------------------------------------
# Pure-JAX reference (mirrors the PyTorch module) for a correctness check
# ----------------------------------------------------------------------------

def one_conv_reference(params, x, *, neg_slope=0.1):
    w, b = params["w"], params["b"]
    y = jax.lax.conv_general_dilated(
        x, w, window_strides=(1, 1), padding=((1, 1), (1, 1)),
        dimension_numbers=("NCHW", "OIHW", "NCHW"))
    y = y + b[None, :, None, None]
    y = jnp.where(y >= 0.0, y, neg_slope * y)
    return jnp.concatenate([x, y], axis=1)


# ----------------------------------------------------------------------------

if __name__ == "__main__":
    B, G0, G, H, W = 2, 8, 16, 16, 16        # small shapes consistent with one_conv(G0, G)

    key = jax.random.PRNGKey(0)
    kx, kw, kb = jax.random.split(key, 3)
    x = jax.random.normal(kx, (B, G0, H, W), jnp.float32)
    params = dict(
        w=jax.random.normal(kw, (G, G0, 3, 3), jnp.float32) * (1.0 / (3.0 * G0 ** 0.5)),
        b=jax.random.normal(kb, (G,), jnp.float32) * 0.1,
    )

    fwd = jax.jit(one_conv_forward)
    out = fwd(params, x)
    jax.block_until_ready(out)

    assert out.shape == (B, G0 + G, H, W), out.shape
    assert bool(jnp.all(jnp.isfinite(out)))

    ref = one_conv_reference(params, x)
    max_err = float(jnp.max(jnp.abs(out - ref)))
    assert max_err < 3e-2, f"max abs error vs XLA reference too large: {max_err}"

    print("KERNEL_OK")
</pallas_src>

<mosaic_0001>
module attributes {stable_mosaic.version = 11 : i64} {
  func.func @_conv3x3_lrelu_kernel(%arg0: i32, %arg1: memref<1x18x18x8xf32, #tpu.memory_space<vmem>>, %arg2: memref<9x8x16xf32, #tpu.memory_space<vmem>>, %arg3: memref<1x16xf32, #tpu.memory_space<vmem>>, %arg4: memref<1x16x16x16xf32, #tpu.memory_space<vmem>>) attributes {dimension_semantics = [#tpu.dimension_semantics<parallel>], iteration_bounds = array<i64: 2>, scalar_prefetch = 0 : i64, scratch_operands = 0 : i64, tpu.core_type = #tpu.core_type<tc>, window_params = [{transform_indices = @transform_0, window_bounds = array<i64: 1, 18, 18, 8>}, {pipeline_mode = #tpu.pipeline_mode<synchronous>, transform_indices = @transform_1, window_bounds = array<i64: 9, 8, 16>}, {pipeline_mode = #tpu.pipeline_mode<synchronous>, transform_indices = @transform_2, window_bounds = array<i64: 1, 16>}, {transform_indices = @transform_3, window_bounds = array<i64: 1, 16, 16, 16>}]} {
    %c0 = arith.constant 0 : index
    %c0_0 = arith.constant 0 : index
    %c0_1 = arith.constant 0 : index
    %c0_2 = arith.constant 0 : index
    %0 = vector.load %arg1[%c0, %c0_0, %c0_1, %c0_2] : memref<1x18x18x8xf32, #tpu.memory_space<vmem>>, vector<1x18x18x8xf32>
    %1 = vector.shape_cast %0 : vector<1x18x18x8xf32> to vector<18x18x8xf32>
    %cst = arith.constant 0.000000e+00 : f32
    %2 = vector.broadcast %cst : f32 to vector<256x16xf32>
    %3 = vector.extract_strided_slice %1 {offsets = [0, 0, 0], sizes = [16, 16, 8], strides = [1, 1, 1]} : vector<18x18x8xf32> to vector<16x16x8xf32>
    %4 = vector.shape_cast %3 : vector<16x16x8xf32> to vector<256x8xf32>
    %c0_3 = arith.constant 0 : index
    %c0_4 = arith.constant 0 : index
    %c0_5 = arith.constant 0 : index
    %5 = vector.load %arg2[%c0_3, %c0_4, %c0_5] : memref<9x8x16xf32, #tpu.memory_space<vmem>>, vector<1x8x16xf32>
    %6 = vector.shape_cast %5 : vector<1x8x16xf32> to vector<8x16xf32>
    %cst_6 = arith.constant dense<0.000000e+00> : vector<256x16xf32>
    %7 = tpu.matmul %4, %6, %cst_6 {dimension_numbers = #tpu.dot_dimension_numbers<[1], [0], [0], [1], [0, 0, 1, 1], [], []>} : vector<256x8xf32>, vector<8x16xf32>, vector<256x16xf32> -> vector<256x16xf32>
    %8 = arith.addf %2, %7 : vector<256x16xf32>
    %9 = vector.extract_strided_slice %1 {offsets = [0, 1, 0], sizes = [16, 16, 8], strides = [1, 1, 1]} : vector<18x18x8xf32> to vector<16x16x8xf32>
    %10 = vector.shape_cast %9 : vector<16x16x8xf32> to vector<256x8xf32>
    %c1 = arith.constant 1 : index
    %c0_7 = arith.constant 0 : index
    %c0_8 = arith.constant 0 : index
    %11 = vector.load %arg2[%c1, %c0_7, %c0_8] : memref<9x8x16xf32, #tpu.memory_space<vmem>>, vector<1x8x16xf32>
    %12 = vector.shape_cast %11 : vector<1x8x16xf32> to vector<8x16xf32>
    %cst_9 = arith.constant dense<0.000000e+00> : vector<256x16xf32>
    %13 = tpu.matmul %10, %12, %cst_9 {dimension_numbers = #tpu.dot_dimension_numbers<[1], [0], [0], [1], [0, 0, 1, 1], [], []>} : vector<256x8xf32>, vector<8x16xf32>, vector<256x16xf32> -> vector<256x16xf32>
    %14 = arith.addf %8, %13 : vector<256x16xf32>
    %15 = vector.extract_strided_slice %1 {offsets = [0, 2, 0], sizes = [16, 16, 8], strides = [1, 1, 1]} : vector<18x18x8xf32> to vector<16x16x8xf32>
    %16 = vector.shape_cast %15 : vector<16x16x8xf32> to vector<256x8xf32>
    %c2 = arith.constant 2 : index
    %c0_10 = arith.constant 0 : index
    %c0_11 = arith.constant 0 : index
    %17 = vector.load %arg2[%c2, %c0_10, %c0_11] : memref<9x8x16xf32, #tpu.memory_space<vmem>>, vector<1x8x16xf32>
    %18 = vector.shape_cast %17 : vector<1x8x16xf32> to vector<8x16xf32>
    %cst_12 = arith.constant dense<0.000000e+00> : vector<256x16xf32>
    %19 = tpu.matmul %16, %18, %cst_12 {dimension_numbers = #tpu.dot_dimension_numbers<[1], [0], [0], [1], [0, 0, 1, 1], [], []>} : vector<256x8xf32>, vector<8x16xf32>, vector<256x16xf32> -> vector<256x16xf32>
    %20 = arith.addf %14, %19 : vector<256x16xf32>
    %21 = vector.extract_strided_slice %1 {offsets = [1, 0, 0], sizes = [16, 16, 8], strides = [1, 1, 1]} : vector<18x18x8xf32> to vector<16x16x8xf32>
    %22 = vector.shape_cast %21 : vector<16x16x8xf32> to vector<256x8xf32>
    %c3 = arith.constant 3 : index
    %c0_13 = arith.constant 0 : index
    %c0_14 = arith.constant 0 : index
    %23 = vector.load %arg2[%c3, %c0_13, %c0_14] : memref<9x8x16xf32, #tpu.memory_space<vmem>>, vector<1x8x16xf32>
    %24 = vector.shape_cast %23 : vector<1x8x16xf32> to vector<8x16xf32>
    %cst_15 = arith.constant dense<0.000000e+00> : vector<256x16xf32>
    %25 = tpu.matmul %22, %24, %cst_15 {dimension_numbers = #tpu.dot_dimension_numbers<[1], [0], [0], [1], [0, 0, 1, 1], [], []>} : vector<256x8xf32>, vector<8x16xf32>, vector<256x16xf32> -> vector<256x16xf32>
    %26 = arith.addf %20, %25 : vector<256x16xf32>
    %27 = vector.extract_strided_slice %1 {offsets = [1, 1, 0], sizes = [16, 16, 8], strides = [1, 1, 1]} : vector<18x18x8xf32> to vector<16x16x8xf32>
    %28 = vector.shape_cast %27 : vector<16x16x8xf32> to vector<256x8xf32>
    %c4 = arith.constant 4 : index
    %c0_16 = arith.constant 0 : index
    %c0_17 = arith.constant 0 : index
    %29 = vector.load %arg2[%c4, %c0_16, %c0_17] : memref<9x8x16xf32, #tpu.memory_space<vmem>>, vector<1x8x16xf32>
    %30 = vector.shape_cast %29 : vector<1x8x16xf32> to vector<8x16xf32>
    %cst_18 = arith.constant dense<0.000000e+00> : vector<256x16xf32>
    %31 = tpu.matmul %28, %30, %cst_18 {dimension_numbers = #tpu.dot_dimension_numbers<[1], [0], [0], [1], [0, 0, 1, 1], [], []>} : vector<256x8xf32>, vector<8x16xf32>, vector<256x16xf32> -> vector<256x16xf32>
    %32 = arith.addf %26, %31 : vector<256x16xf32>
    %33 = vector.extract_strided_slice %1 {offsets = [1, 2, 0], sizes = [16, 16, 8], strides = [1, 1, 1]} : vector<18x18x8xf32> to vector<16x16x8xf32>
    %34 = vector.shape_cast %33 : vector<16x16x8xf32> to vector<256x8xf32>
    %c5 = arith.constant 5 : index
    %c0_19 = arith.constant 0 : index
    %c0_20 = arith.constant 0 : index
    %35 = vector.load %arg2[%c5, %c0_19, %c0_20] : memref<9x8x16xf32, #tpu.memory_space<vmem>>, vector<1x8x16xf32>
    %36 = vector.shape_cast %35 : vector<1x8x16xf32> to vector<8x16xf32>
    %cst_21 = arith.constant dense<0.000000e+00> : vector<256x16xf32>
    %37 = tpu.matmul %34, %36, %cst_21 {dimension_numbers = #tpu.dot_dimension_numbers<[1], [0], [0], [1], [0, 0, 1, 1], [], []>} : vector<256x8xf32>, vector<8x16xf32>, vector<256x16xf32> -> vector<256x16xf32>
    %38 = arith.addf %32, %37 : vector<256x16xf32>
    %39 = vector.extract_strided_slice %1 {offsets = [2, 0, 0], sizes = [16, 16, 8], strides = [1, 1, 1]} : vector<18x18x8xf32> to vector<16x16x8xf32>
    %40 = vector.shape_cast %39 : vector<16x16x8xf32> to vector<256x8xf32>
    %c6 = arith.constant 6 : index
    %c0_22 = arith.constant 0 : index
    %c0_23 = arith.constant 0 : index
    %41 = vector.load %arg2[%c6, %c0_22, %c0_23] : memref<9x8x16xf32, #tpu.memory_space<vmem>>, vector<1x8x16xf32>
    %42 = vector.shape_cast %41 : vector<1x8x16xf32> to vector<8x16xf32>
    %cst_24 = arith.constant dense<0.000000e+00> : vector<256x16xf32>
    %43 = tpu.matmul %40, %42, %cst_24 {dimension_numbers = #tpu.dot_dimension_numbers<[1], [0], [0], [1], [0, 0, 1, 1], [], []>} : vector<256x8xf32>, vector<8x16xf32>, vector<256x16xf32> -> vector<256x16xf32>
    %44 = arith.addf %38, %43 : vector<256x16xf32>
    %45 = vector.extract_strided_slice %1 {offsets = [2, 1, 0], sizes = [16, 16, 8], strides = [1, 1, 1]} : vector<18x18x8xf32> to vector<16x16x8xf32>
    %46 = vector.shape_cast %45 : vector<16x16x8xf32> to vector<256x8xf32>
    %c7 = arith.constant 7 : index
    %c0_25 = arith.constant 0 : index
    %c0_26 = arith.constant 0 : index
    %47 = vector.load %arg2[%c7, %c0_25, %c0_26] : memref<9x8x16xf32, #tpu.memory_space<vmem>>, vector<1x8x16xf32>
    %48 = vector.shape_cast %47 : vector<1x8x16xf32> to vector<8x16xf32>
    %cst_27 = arith.constant dense<0.000000e+00> : vector<256x16xf32>
    %49 = tpu.matmul %46, %48, %cst_27 {dimension_numbers = #tpu.dot_dimension_numbers<[1], [0], [0], [1], [0, 0, 1, 1], [], []>} : vector<256x8xf32>, vector<8x16xf32>, vector<256x16xf32> -> vector<256x16xf32>
    %50 = arith.addf %44, %49 : vector<256x16xf32>
    %51 = vector.extract_strided_slice %1 {offsets = [2, 2, 0], sizes = [16, 16, 8], strides = [1, 1, 1]} : vector<18x18x8xf32> to vector<16x16x8xf32>
    %52 = vector.shape_cast %51 : vector<16x16x8xf32> to vector<256x8xf32>
    %c8 = arith.constant 8 : index
    %c0_28 = arith.constant 0 : index
    %c0_29 = arith.constant 0 : index
    %53 = vector.load %arg2[%c8, %c0_28, %c0_29] : memref<9x8x16xf32, #tpu.memory_space<vmem>>, vector<1x8x16xf32>
    %54 = vector.shape_cast %53 : vector<1x8x16xf32> to vector<8x16xf32>
    %cst_30 = arith.constant dense<0.000000e+00> : vector<256x16xf32>
    %55 = tpu.matmul %52, %54, %cst_30 {dimension_numbers = #tpu.dot_dimension_numbers<[1], [0], [0], [1], [0, 0, 1, 1], [], []>} : vector<256x8xf32>, vector<8x16xf32>, vector<256x16xf32> -> vector<256x16xf32>
    %56 = arith.addf %50, %55 : vector<256x16xf32>
    %c0_31 = arith.constant 0 : index
    %c0_32 = arith.constant 0 : index
    %57 = vector.load %arg3[%c0_31, %c0_32] : memref<1x16xf32, #tpu.memory_space<vmem>>, vector<1x16xf32>
    %58 = vector.broadcast %57 : vector<1x16xf32> to vector<256x16xf32>
    %59 = arith.addf %56, %58 : vector<256x16xf32>
    %cst_33 = arith.constant 0.000000e+00 : f32
    %60 = vector.broadcast %cst_33 : f32 to vector<256x16xf32>
    %61 = arith.cmpf oge, %59, %60 : vector<256x16xf32>
    %cst_34 = arith.constant 1.000000e-01 : f32
    %62 = vector.broadcast %cst_34 : f32 to vector<256x16xf32>
    %63 = arith.mulf %62, %59 : vector<256x16xf32>
    %64 = arith.select %61, %59, %63 : vector<256x16xi1>, vector<256x16xf32>
    %65 = vector.shape_cast %64 : vector<256x16xf32> to vector<16x16x16xf32>
    %c0_35 = arith.constant 0 : index
    %c0_36 = arith.constant 0 : index
    %c0_37 = arith.constant 0 : index
    %c0_38 = arith.constant 0 : index
    %66 = vector.load %arg4[%c0_35, %c0_36, %c0_37, %c0_38] : memref<1x16x16x16xf32, #tpu.memory_space<vmem>>, vector<1x16x16x16xf32>
    %67 = vector.shape_cast %66 : vector<1x16x16x16xf32> to vector<16x16x16xf32>
    %68 = vector.shape_cast %65 : vector<16x16x16xf32> to vector<1x16x16x16xf32>
    tpu.vector_store %arg4[%c0_35, %c0_36, %c0_37, %c0_38], %68 {strides = array<i32>} : memref<1x16x16x16xf32, #tpu.memory_space<vmem>>, vector<1x16x16x16xf32>,
    return
  }
  func.func @transform_0(%arg0: i32) -> (i32, i32, i32, i32) {
    %c0_i32 = arith.constant 0 : i32
    %c0_i32_0 = arith.constant 0 : i32
    %c0_i32_1 = arith.constant 0 : i32
    %c0_i32_2 = arith.constant 0 : i32
    return %arg0, %c0_i32, %c0_i32_0, %c0_i32_1 : i32, i32, i32, i32
  }
  func.func @transform_1(%arg0: i32) -> (i32, i32, i32) {
    %c0_i32 = arith.constant 0 : i32
    %c0_i32_0 = arith.constant 0 : i32
    %c0_i32_1 = arith.constant 0 : i32
    %c0_i32_2 = arith.constant 0 : i32
    return %c0_i32, %c0_i32_0, %c0_i32_1 : i32, i32, i32
  }
  func.func @transform_2(%arg0: i32) -> (i32, i32) {
    %c0_i32 = arith.constant 0 : i32
    %c0_i32_0 = arith.constant 0 : i32
    %c0_i32_1 = arith.constant 0 : i32
    return %c0_i32, %c0_i32_0 : i32, i32
  }
  func.func @transform_3(%arg0: i32) -> (i32, i32, i32, i32) {
    %c0_i32 = arith.constant 0 : i32
    %c0_i32_0 = arith.constant 0 : i32
    %c0_i32_1 = arith.constant 0 : i32
    %c0_i32_2 = arith.constant 0 : i32
    return %arg0, %c0_i32, %c0_i32_0, %c0_i32_1 : i32, i32, i32, i32
  }
}

</mosaic_0001>

<bundles_post_ra>
// kernel: one_conv_forward.1
= control target key start
LH: loop header
LB: loop body
LE: loop exit
PB: predicated region body
PF: predicated region fallthrough
CT: control target
= control target key end

     0   :  { %s4517_s12 = smov 0   ;;  %s5750_s0 = inlined_call_operand.vmem [shape: f32[2,18,18,8], index: 0, kind: input, shape index: {}]   ;;  %s5751_s1 = inlined_call_operand.vmem [shape: f32[9,8,16], index: 1, kind: input, shape index: {}]   ;;  %s5752_s2 = inlined_call_operand.vmem [shape: f32[1,16], index: 2, kind: input, shape index: {}]   ;;  %s5753_s3 = inlined_call_operand.vmem [shape: f32[2,16,16,16], index: 3, kind: output, shape index: {}]  }
   0x1 LB: > { %s3167_s13 = sadd.s32 4294967295, %s4495_s12   ;;  %p3171_p0 = scmp.ge.s32.totalorder %s4495_s12, 1  ;;  %s4495_s12 = sphi %s4517_s12, %s13_s12  }
   0x2   : > { %p137_p1 = scmp.lt.s32.totalorder %s4495_s12, 3 }
   0x4   : > { %p138_p2 = pnand %p3171_p0, %p137_p1 }
   0x6   : > { %141 = sbr.rel (%p138_p2) target bundleno = 530 (0x212), region = 32 }
   0xd   : > { %v3175_v0 = vld [vmem:[%s5751_s1 + $0x8] sm:$0xff]  ;;  %v4531_v1 = vld [vmem:[%s5751_s1 + $0x20] sm:$0xff]  ;;  %p161_p3 = scmp.lt.s32.totalorder %s3167_s13, 1  ;;  %vm274_vm0 = vcmask 1046528   ;;  %vm357_vm1 = vcmask 64512   ;;  %v4612_v33 = vld [vmem:[%s5751_s1 + $0x30] sm:$0xff] }
   0xe   : > { %v225_v2 = vld [vmem:[%s5751_s1] sm:$0xff]  ;;  %3772 = vmatprep.subr.mxu1 %v3175_v0  ;;  %3972 = vmatprep.subr.mxu0 %v4531_v1  ;;  %v3339_v3 = vld [vmem:[%s5751_s1 + $0x28] sm:$0xff]  ;;  %v4621_v35 = vld [vmem:[%s5751_s1 + $0x10] sm:$0xff]  ;;  %vm936_vm2 = vcmask 1045504   ;;  %vm3079_vm4 = vcmask 130048  }
   0xf   : > { %3773 = vmatpush3.msra.mxu1 %v3175_v0  ;;  %3973 = vmatpush3.msra.mxu0 %v4531_v1  ;;  %s5929_s13 = smov (!%p161_p3, %s3167_s13), 1 }
  0x10   : > { %3822 = vmatprep.subr.mxu1 %v225_v2  ;;  %4022 = vmatprep.subr.mxu0 %v3339_v3  ;;  %s4480_s22 = smul.u32 432, %s5929_s13  ;;  %s3474_s11 = sshll.u32 %s5929_s13, 8 }
  0x11   : > { %s5643_s16 = scalar_lea.vmem %s5753_s3, %s3474_s11 }
  0x12   : > { %s4547_s25 = scalar_lea.vmem %s5750_s0, %s4480_s22 }
  0x13   : > { %v4550_v4 = vld [vmem:[%s4547_s25] sm:$0xff]  ;;  %v4553_v5 = vld [vmem:[%s4547_s25 + $0x8] sm:$0xff]  ;;  %v4556_v6 = vld [vmem:[%s4547_s25 + $0x18] sm:$0xff] }
  0x14   : > { %5827 = vst [vmem:[#allocation2_spill] sm:$0xff] %v4556_v6  ;;  %v275_v7 = vrot.slane %v4550_v4, 1  ;;  %v276_v8 = vrot.slane %v4553_v5, 1  ;;  %v4561_v9 = vld [vmem:[%s4547_s25 + $0x20] sm:$0xff]  ;;  %v280_v10 = vrot.slane %v4556_v6, 1  ;;  %v4573_v15 = vld [vmem:[%s4547_s25 + $0x30] sm:$0xff] }
  0x15   : > { %5828 = vst [vmem:[#allocation3_spill] sm:$0xff] %v4561_v9  ;;  %v4565_v11 = vld [vmem:[%s4547_s25 + $0x10] sm:$0x3]  ;;  %v281_v12 = vrot.slane %v4561_v9, 1  ;;  %v4570_v14 = vld [vmem:[%s4547_s25 + $0x28] sm:$0x3] }
  0x16   : > { %v278_v13 = vrot.slane %v4565_v11, 1  ;;  %v277_v16 = vsel %vm274_vm0, %v275_v7, %v276_v8  ;;  %v283_v17 = vrot.slane %v4570_v14, 1  ;;  %v4578_v18 = vld [vmem:[%s4547_s25 + $0x38] sm:$0xff]  ;;  %v285_v19 = vrot.slane %v4573_v15, 1  ;;  %v4582_v20 = vld [vmem:[%s4547_s25 + $0x40] sm:$0x3] }
  0x17   : > { %3774 = vmatprep.mubr.msk.f32.mxu1 %vm357_vm1, %v277_v16  ;;  %v282_v21 = vsel %vm274_vm0, %v280_v10, %v281_v12  ;;  %v286_v23 = vrot.slane %v4578_v18, 1  ;;  %v288_v24 = vrot.slane %v4582_v20, 1  ;;  %v4590_v25 = vld [vmem:[%s4547_s25 + $0x48] sm:$0xff]  ;;  %v4593_v26 = vld [vmem:[%s4547_s25 + $0x50] sm:$0xff]  ;;  %v4596_v27 = vld [vmem:[%s4547_s25 + $0x58] sm:$0x3] }
  0x18   : > { %v279_v22 = vsel %vm274_vm0, %v276_v8, %v278_v13  ;;  %3974 = vmatprep.mubr.msk.f32.mxu0 %vm357_vm1, %v282_v21  ;;  %v284_v28 = vsel %vm274_vm0, %v281_v12, %v283_v17  ;;  %v290_v29 = vrot.slane %v4590_v25, 1  ;;  %v291_v30 = vrot.slane %v4593_v26, 1  ;;  %v4604_v31 = vld [vmem:[%s4547_s25 + $0x60] sm:$0xff]  ;;  %v4607_v32 = vld [vmem:[%s4547_s25 + $0x68] sm:$0xff]  ;;  %v4636_v41 = vld [vmem:[%s4547_s25 + $0x70] sm:$0x3] }
  0x19   : > { %3775 = vmatmul.mubr.msk.f32.vlgmr.msra.gmra.mrb[0].mxu1 %vm357_vm1, %v279_v22  ;;  %3975 = vmatmul.mubr.msk.f32.vlgmr.msra.gmra.mrb[0].mxu0 %vm357_vm1, %v284_v28  ;;  %v4616_v34 = vsel %vm274_vm0, %v285_v19, %v286_v23  ;;  %v4625_v36 = vsel %vm274_vm0, %v286_v23, %v288_v24  ;;  %v293_v37 = vrot.slane %v4596_v27, 1  ;;  %v295_v39 = vrot.slane %v4604_v31, 1  ;;  %v4641_v42 = vld [vmem:[%s4547_s25 + $0x78] sm:$0xff]  ;;  %v4644_v43 = vld [vmem:[%s4547_s25 + $0x80] sm:$0xff]  ;;  %v4663_v49 = vld [vmem:[%s4547_s25 + $0x88] sm:$0x3] }
  0x1a   : > { %3823 = vmatpush3.msra.mxu1 %v225_v2  ;;  %5829 = vst [vmem:[#allocation4_spill] sm:$0xff] %v4616_v34  ;;  %4023 = vmatpush3.msra.mxu0 %v3339_v3  ;;  %5830 = vst [vmem:[#allocation5_spill] sm:$0xff] %v4625_v36  ;;  %v4631_v38 = vsel %vm274_vm0, %v290_v29, %v291_v30  ;;  %v296_v40 = vrot.slane %v4607_v32, 1  ;;  %v298_v45 = vrot.slane %v4636_v41, 1  ;;  %v300_v47 = vrot.slane %v4641_v42, 1  ;;  %v4668_v50 = vld [vmem:[%s4547_s25 + $0x90] sm:$0xff] }
  0x1b   : > { %3777 = vmatprep.mubr.msk.f32.mxu1 %vm357_vm1, %v282_v21  ;;  %3977 = vmatprep.mubr.msk.f32.mxu0 %vm357_vm1, %v4616_v34  ;;  %5831 = vst [vmem:[#allocation6_spill] sm:$0xff] %v4631_v38  ;;  %v4654_v44 = vsel %vm274_vm0, %v291_v30, %v293_v37  ;;  %v301_v48 = vrot.slane %v4644_v43, 1  ;;  %v4671_v51 = vld [vmem:[%s4547_s25 + $0x98] sm:$0xff]  ;;  %v303_v53 = vrot.slane %v4663_v49, 1  ;;  %v305_v55 = vrot.slane %v4668_v50, 1  ;;  %v4694_v58 = vld [vmem:[%s4547_s25 + $0xa8] sm:$0xff] }
  0x1c   : > { %4072 = vmatprep.subr.mxu0 %v4612_v33  ;;  %3872 = vmatprep.subr.mxu1 %v4621_v35  ;;  %5832 = vst [vmem:[#allocation7_spill] sm:$0xff] %v4654_v44  ;;  %v4658_v46 = vsel %vm274_vm0, %v295_v39, %v296_v40  ;;  %v4680_v52 = vsel %vm274_vm0, %v296_v40, %v298_v45  ;;  %v306_v56 = vrot.slane %v4671_v51, 1  ;;  %v4689_v57 = vld [vmem:[%s4547_s25 + $0xa0] sm:$0x3]  ;;  %v4697_v59 = vld [vmem:[%s4547_s25 + $0xb0] sm:$0xff]  ;;  %v310_v63 = vrot.slane %v4694_v58, 1 }
  0x1d   : > { %3778 = vmatmul.mubr.msk.f32.gmra.mrb[2].mxu1 %vm357_vm1, %v284_v28  ;;  %3978 = vmatmul.mubr.msk.f32.gmra.mrb[2].mxu0 %vm357_vm1, %v4625_v36  ;;  %5833 = vst [vmem:[#allocation8_spill] sm:$0xff] %v4658_v46  ;;  %5834 = vst [vmem:[#allocation9_spill] sm:$0xff] %v4680_v52  ;;  %v4684_v54 = vsel %vm274_vm0, %v300_v47, %v301_v48  ;;  %v4706_v60 = vsel %vm274_vm0, %v301_v48, %v303_v53  ;;  %v308_v61 = vrot.slane %v4689_v57, 1  ;;  %v4715_v2 = vld [vmem:[%s4547_s25 + $0xb8] sm:$0x3]  ;;  %v4720_v3 = vld [vmem:[%s4547_s25 + $0xc0] sm:$0xff] }
  0x1e   : > { %3780 = vmatprep.mubr.msk.f32.mxu1 %vm357_vm1, %v4616_v34  ;;  %3980 = vmatprep.mubr.msk.f32.mxu0 %vm357_vm1, %v4631_v38  ;;  %5835 = vst [vmem:[#allocation10_spill] sm:$0xff] %v4684_v54  ;;  %5836 = vst [vmem:[#allocation11_spill] sm:$0xff] %v4706_v60  ;;  %v4710_v62 = vsel %vm274_vm0, %v305_v55, %v306_v56  ;;  %v311_v0 = vrot.slane %v4697_v59, 1  ;;  %v4723_v7 = vld [vmem:[%s4547_s25 + $0xc8] sm:$0xff]  ;;  %v313_v10 = vrot.slane %v4715_v2, 1  ;;  %v315_v13 = vrot.slane %v4720_v3, 1 }
  0x1f   : > { %5837 = vst [vmem:[#allocation12_spill] sm:$0xff] %v4710_v62  ;;  %v4732_v8 = vsel %vm274_vm0, %v306_v56, %v308_v61  ;;  %v316_v16 = vrot.slane %v4723_v7, 1  ;;  %v4741_v17 = vld [vmem:[%s4547_s25 + $0xd0] sm:$0x3]  ;;  %v942_v23 = vrot.slane %v4556_v6, 2  ;;  %v943_v24 = vrot.slane %v4561_v9, 2 }
  0x20   : > { %5838 = vst [vmem:[#allocation13_spill] sm:$0xff] %v4732_v8  ;;  %v4736_v12 = vsel %vm274_vm0, %v310_v63, %v311_v0  ;;  %v4752_v19 = vsel %vm274_vm0, %v311_v0, %v313_v10  ;;  %v318_v21 = vrot.slane %v4741_v17, 1  ;;  %v4761_v28 = vld [vmem:[%s4547_s25 + $0xd8] sm:$0xff]  ;;  %v4764_v29 = vld [vmem:[%s4547_s25 + $0xe0] sm:$0xff]  ;;  %v945_v30 = vrot.slane %v4570_v14, 2  ;;  %v4789_v53 = vld [vmem:[%s4547_s25 + $0xf0] sm:$0xff] }
  0x21   : > { %3781 = vmatmul.mubr.msk.f32.gmra.mrb[4].mxu1 %vm357_vm1, %v4625_v36  ;;  %3981 = vmatmul.mubr.msk.f32.gmra.mrb[4].mxu0 %vm357_vm1, %v4654_v44  ;;  %5839 = vst [vmem:[#allocation14_spill] sm:$0xff] %v4736_v12  ;;  %5840 = vst [vmem:[#allocation15_spill] sm:$0xff] %v4752_v19  ;;  %v4756_v22 = vsel %vm274_vm0, %v315_v13, %v316_v16  ;;  %v320_v39 = vrot.slane %v4761_v28, 1  ;;  %v321_v40 = vrot.slane %v4764_v29, 1  ;;  %v4781_v45 = vld [vmem:[%s4547_s25 + $0xe8] sm:$0x3] }
  0x22   : > { %3783 = vmatprep.mubr.msk.f32.mxu1 %vm357_vm1, %v4631_v38  ;;  %3983 = vmatprep.mubr.msk.f32.mxu0 %vm357_vm1, %v4658_v46  ;;  %5841 = vst [vmem:[#allocation16_spill] sm:$0xff] %v4756_v22  ;;  %v4776_v37 = vsel %vm274_vm0, %v316_v16, %v318_v21  ;;  %v4784_v47 = vsel %vm936_vm2, %v942_v23, %v943_v24  ;;  %v947_v48 = vrot.slane %v4573_v15, 2  ;;  %v948_v14 = vrot.slane %v4578_v18, 2  ;;  %v4792_v55 = vld [vmem:[%s4547_s25 + $0xf8] sm:$0xff]  ;;  %v4813_v16 = vld [vmem:[%s4547_s25 + $0x100] sm:$0x3] }
  0x23   : > { %5842 = vst [vmem:[#allocation17_spill] sm:$0xff] %v4776_v37  ;;  %v323_v56 = vrot.slane %v4781_v45, 1  ;;  %v950_v61 = vrot.slane %v4582_v20, 2  ;;  %v4805_v63 = vsel %vm936_vm2, %v943_v24, %v945_v30  ;;  %v4808_v0 = vsel %vm274_vm0, %v320_v39, %v321_v40  ;;  %v4824_v24 = vld [vmem:[%s4547_s25 + $0x110] sm:$0xff]  ;;  %v4831_v30 = vld [vmem:[%s5751_s1 + $0x38] sm:$0xff] }
  0x24   : > { %5843 = vst [vmem:[#allocation18_spill] sm:$0xff] %v4808_v0  ;;  %v325_v10 = vrot.slane %v4789_v53, 1  ;;  %v326_v13 = vrot.slane %v4792_v55, 1  ;;  %v4816_v21 = vsel %vm936_vm2, %v947_v48, %v948_v14  ;;  %v952_v20 = vrot.slane %v4590_v25, 2  ;;  %v4925_v36 = vld [vmem:[%s4547_s25 + $0x148] sm:$0x3] }
  0x25   : > { %3784 = vmatmul.mubr.msk.f32.gmra.mrb[6].mxu1 %vm357_vm1, %v4654_v44  ;;  %3984 = vmatmul.mubr.msk.f32.gmra.mrb[6].mxu0 %vm357_vm1, %v4680_v52  ;;  %v953_v23 = vrot.slane %v4593_v26, 2  ;;  %v4838_v39 = vsel %vm274_vm0, %v321_v40, %v323_v56  ;;  %v4841_v48 = vsel %vm936_vm2, %v948_v14, %v950_v61  ;;  %v331_v40 = vrot.slane %v4824_v24, 1  ;;  %v4854_v56 = vld [vmem:[%s4547_s25 + $0x118] sm:$0x3] }
  0x26   : > { %3786 = vmatprep.mubr.msk.f32.mxu1 %vm357_vm1, %v4658_v46  ;;  %3986 = vmatprep.mubr.msk.f32.mxu0 %vm357_vm1, %v4684_v54  ;;  %5844 = vst [vmem:[#allocation19_spill] sm:$0xff] %v4838_v39  ;;  %5845 = vst [vmem:[#allocation20_spill] sm:$0xff] %v4841_v48  ;;  %v957_v61 = vrot.slane %v4604_v31, 2  ;;  %v4898_v46 = vld [vmem:[%s4547_s25 + $0x138] sm:$0xff]  ;;  %v965_v44 = vrot.slane %v4663_v49, 2  ;;  %v970_v34 = vrot.slane %v4689_v57, 2 }
  0x27   : > { %v4857_v14 = vsel %vm936_vm2, %v952_v20, %v953_v23  ;;  %v333_v20 = vrot.slane %v4854_v56, 1  ;;  %v340_v38 = vrot.slane %v4898_v46, 1  ;;  %v972_v57 = vrot.slane %v4694_v58, 2 }
  0x28   : > { %5847 = vst [vmem:[#allocation22_spill] sm:$0xff] %v4857_v14 }
  0x29   : > { %3787 = vmatmul.mubr.msk.f32.gmra.mrb[8].mxu1 %vm357_vm1, %v4680_v52  ;;  %3987 = vmatmul.mubr.msk.f32.gmra.mrb[8].mxu0 %vm357_vm1, %v4706_v60  ;;  %v4890_v52 = vld [vmem:[%s4547_s25 + $0x130] sm:$0x3] }
  0x2a   : > { %3789 = vmatprep.mubr.msk.f32.mxu1 %vm357_vm1, %v4684_v54  ;;  %3989 = vmatprep.mubr.msk.f32.mxu0 %vm357_vm1, %v4710_v62 }
  0x2d   : > { %3790 = vmatmul.mubr.msk.f32.gmra.mrb[10].mxu1 %vm357_vm1, %v4706_v60  ;;  %3990 = vmatmul.mubr.msk.f32.gmra.mrb[10].mxu0 %vm357_vm1, %v4732_v8 }
  0x2e   : > { %3792 = vmatprep.mubr.msk.f32.mxu1 %vm357_vm1, %v4710_v62  ;;  %3992 = vmatprep.mubr.msk.f32.mxu0 %vm357_vm1, %v4736_v12  ;;  %v960_v62 = vrot.slane %v4636_v41, 2  ;;  %v962_v41 = vrot.slane %v4641_v42, 2 }
  0x31   : > { %3793 = vmatmul.mubr.msk.f32.gmra.mrb[12].mxu1 %vm357_vm1, %v4732_v8  ;;  %3993 = vmatmul.mubr.msk.f32.gmra.mrb[12].mxu0 %vm357_vm1, %v4752_v19  ;;  %v4862_v8 = vld [vmem:[%s4547_s25 + $0x120] sm:$0xff] }
  0x32   : > { %3795 = vmatprep.mubr.msk.f32.mxu1 %vm357_vm1, %v4736_v12  ;;  %3995 = vmatprep.mubr.msk.f32.mxu0 %vm357_vm1, %v4756_v22  ;;  %v955_v12 = vrot.slane %v4596_v27, 2  ;;  %v335_v54 = vrot.slane %v4862_v8, 1 }
  0x34   : > { %v4882_v60 = vsel %vm936_vm2, %v953_v23, %v955_v12  ;;  %v4901_v12 = vld [vmem:[%s4547_s25 + $0x140] sm:$0xff] }
  0x35   : > { %3796 = vmatmul.mubr.msk.f32.gmra.mrb[14].mxu1 %vm357_vm1, %v4752_v19  ;;  %3996 = vmatmul.mubr.msk.f32.gmra.mrb[14].mxu0 %vm357_vm1, %v4776_v37  ;;  %v4848_v19 = vsel %vm274_vm0, %v325_v10, %v326_v13  ;;  %v4865_v10 = vld [vmem:[%s4547_s25 + $0x128] sm:$0xff]  ;;  %5849 = vst [vmem:[#allocation24_spill] sm:$0xff] %v4882_v60 }
  0x36   : > { %3798 = vmatprep.mubr.msk.f32.mxu1 %vm357_vm1, %v4756_v22  ;;  %4024 = vmatprep.mubr.msk.f32.mxu0 %vm357_vm1, %v4784_v47  ;;  %v4821_v22 = vld [vmem:[%s4547_s25 + $0x108] sm:$0xff]  ;;  %5846 = vst [vmem:[#allocation21_spill] sm:$0xff] %v4848_v19 }
  0x39   : > { %3799 = vmatmul.mubr.msk.f32.gmra.mrb[16].mxu1 %vm357_vm1, %v4776_v37  ;;  %4025 = vmatmul.mubr.msk.f32.vlgmr.msra.gmra.mrb[0].mxu0 %vm357_vm1, %v4805_v63  ;;  %v328_v37 = vrot.slane %v4813_v16, 1 }
  0x3a   : > { %3801 = vmatprep.mubr.msk.f32.mxu1 %vm357_vm1, %v4808_v0  ;;  %4073 = vmatpush3.msra.mxu0 %v4612_v33  ;;  %v330_v0 = vrot.slane %v4821_v22, 1  ;;  %v958_v33 = vrot.slane %v4607_v32, 2 }
  0x3b   : > { %4027 = vmatprep.mubr.msk.f32.mxu0 %vm357_vm1, %v4816_v21  ;;  %4122 = vmatprep.subr.mxu0 %v4831_v30  ;;  %v4875_v27 = vsel %vm274_vm0, %v326_v13, %v328_v37  ;;  %v963_v13 = vrot.slane %v4644_v43, 2 }
  0x3c   : > { %5848 = vst [vmem:[#allocation23_spill] sm:$0xff] %v4875_v27  ;;  %v4893_v37 = vsel %vm936_vm2, %v957_v61, %v958_v33  ;;  %v4913_v23 = vsel %vm936_vm2, %v958_v33, %v960_v62  ;;  %v338_v61 = vrot.slane %v4890_v52, 1  ;;  %v967_v62 = vrot.slane %v4668_v50, 2 }
  0x3d   : > { %3802 = vmatmul.mubr.msk.f32.gmra.mrb[18].mxu1 %vm357_vm1, %v4838_v39  ;;  %4028 = vmatmul.mubr.msk.f32.gmra.mrb[2].mxu0 %vm357_vm1, %v4841_v48  ;;  %v4885_v39 = vsel %vm274_vm0, %v330_v0, %v331_v40  ;;  %5851 = vst [vmem:[#allocation26_spill] sm:$0xff] %v4893_v37  ;;  %v4910_v0 = vsel %vm274_vm0, %v331_v40, %v333_v20  ;;  %5853 = vst [vmem:[#allocation28_spill] sm:$0xff] %v4913_v23  ;;  %v968_v33 = vrot.slane %v4671_v51, 2  ;;  %v4933_v20 = vld [vmem:[%s4547_s25 + $0x150] sm:$0xff]  ;;  %v4995_v48 = vld [vmem:[%s4547_s25 + $0x178] sm:$0x3] }
  0x3e   : > { %3804 = vmatprep.mubr.msk.f32.mxu1 %vm357_vm1, %v4848_v19  ;;  %4030 = vmatprep.mubr.msk.f32.mxu0 %vm357_vm1, %v4857_v14  ;;  %5850 = vst [vmem:[#allocation25_spill] sm:$0xff] %v4885_v39  ;;  %v336_v19 = vrot.slane %v4865_v10, 1  ;;  %5852 = vst [vmem:[#allocation27_spill] sm:$0xff] %v4910_v0  ;;  %v4928_v40 = vsel %vm936_vm2, %v962_v41, %v963_v13  ;;  %v343_v41 = vrot.slane %v4925_v36, 1 }
  0x3f   : > { %5855 = vst [vmem:[#allocation30_spill] sm:$0xff] %v4928_v40 }
  0x40   : > { %v4945_v49 = vsel %vm274_vm0, %v336_v19, %v338_v61  ;;  %v973_v61 = vrot.slane %v4697_v59, 2 }
  0x41   : > { %3805 = vmatmul.mubr.msk.f32.gmra.mrb[20].mxu1 %vm357_vm1, %v4875_v27  ;;  %4031 = vmatmul.mubr.msk.f32.gmra.mrb[4].mxu0 %vm357_vm1, %v4882_v60  ;;  %v4919_v27 = vsel %vm274_vm0, %v335_v54, %v336_v19  ;;  %v4936_v54 = vld [vmem:[%s4547_s25 + $0x158] sm:$0xff]  ;;  %5856 = vst [vmem:[#allocation31_spill] sm:$0xff] %v4945_v49  ;;  %v4960_v60 = vld [vmem:[%s4547_s25 + $0x160] sm:$0x3]  ;;  %v4963_v19 = vsel %vm936_vm2, %v967_v62, %v968_v33 }
  0x42   : > { %3807 = vmatprep.mubr.msk.f32.mxu1 %vm357_vm1, %v4885_v39  ;;  %4033 = vmatprep.mubr.msk.f32.mxu0 %vm357_vm1, %v4893_v37  ;;  %5854 = vst [vmem:[#allocation29_spill] sm:$0xff] %v4919_v27  ;;  %v341_v39 = vrot.slane %v4901_v12, 1  ;;  %v4952_v37 = vsel %vm936_vm2, %v963_v13, %v965_v44  ;;  %v4971_v44 = vld [vmem:[%s4547_s25 + $0x170] sm:$0xff]  ;;  %v4983_v13 = vsel %vm936_vm2, %v968_v33, %v970_v34  ;;  %v348_v62 = vrot.slane %v4960_v60, 1 }
  0x43   : > { %5857 = vst [vmem:[#allocation32_spill] sm:$0xff] %v4952_v37  ;;  %5859 = vst [vmem:[#allocation34_spill] sm:$0xff] %v4971_v44  ;;  %v977_v34 = vrot.slane %v4720_v3, 2  ;;  %v978_v33 = vrot.slane %v4723_v7, 2 }
  0x44   : > { %5861 = vst [vmem:[#allocation36_spill] sm:$0xff] %v4983_v13 }
  0x45   : > { %3808 = vmatmul.mubr.msk.f32.gmra.mrb[22].mxu1 %vm357_vm1, %v4910_v0  ;;  %4034 = vmatmul.mubr.msk.f32.gmra.mrb[6].mxu0 %vm357_vm1, %v4913_v23  ;;  %v4955_v0 = vsel %vm274_vm0, %v340_v38, %v341_v39  ;;  %v345_v23 = vrot.slane %v4933_v20, 1  ;;  %v4980_v38 = vsel %vm274_vm0, %v341_v39, %v343_v41  ;;  %v4998_v39 = vsel %vm936_vm2, %v972_v57, %v973_v61 }
  0x46   : > { %3810 = vmatprep.mubr.msk.f32.mxu1 %vm357_vm1, %v4919_v27  ;;  %4036 = vmatprep.mubr.msk.f32.mxu0 %vm357_vm1, %v4928_v40  ;;  %5858 = vst [vmem:[#allocation33_spill] sm:$0xff] %v4955_v0  ;;  %v346_v27 = vrot.slane %v4936_v54, 1  ;;  %v4968_v40 = vld [vmem:[%s4547_s25 + $0x168] sm:$0xff]  ;;  %5860 = vst [vmem:[#allocation35_spill] sm:$0xff] %v4980_v38 }
  0x48   : > { %v4989_v14 = vsel %vm274_vm0, %v345_v23, %v346_v27  ;;  %v353_v23 = vrot.slane %v4995_v48, 1 }
  0x49   : > { %3811 = vmatmul.mubr.msk.f32.gmra.mrb[24].mxu1 %vm357_vm1, %v4945_v49  ;;  %4037 = vmatmul.mubr.msk.f32.gmra.mrb[8].mxu0 %vm357_vm1, %v4952_v37  ;;  %5862 = vst [vmem:[#allocation37_spill] sm:$0xff] %v4989_v14  ;;  %v975_v49 = vrot.slane %v4715_v2, 2  ;;  %v350_v37 = vrot.slane %v4968_v40, 1  ;;  %v5009_v2 = vsel %vm274_vm0, %v346_v27, %v348_v62  ;;  %v983_v27 = vrot.slane %v4764_v29, 2 }
  0x4a   : > { %3813 = vmatprep.mubr.msk.f32.mxu1 %vm357_vm1, %v4955_v0  ;;  %4039 = vmatprep.mubr.msk.f32.mxu0 %vm357_vm1, %v4963_v19  ;;  %v351_v0 = vrot.slane %v4971_v44, 1  ;;  %5863 = vst [vmem:[#allocation38_spill] sm:$0xff] %v5009_v2  ;;  %v987_v62 = vrot.slane %v4789_v53, 2 }
  0x4b   : > { %v5015_v41 = vsel %vm936_vm2, %v973_v61, %v975_v49  ;;  %v985_v49 = vrot.slane %v4781_v45, 2 }
  0x4c   : > { %v5018_v57 = vsel %vm274_vm0, %v350_v37, %v351_v0  ;;  %v5033_v37 = vsel %vm274_vm0, %v351_v0, %v353_v23  ;;  %v5068_v23 = vld [vmem:[%s5751_s1 + $0x18] sm:$0xff] }
  0x4d   : > { %3814 = vmatmul.mubr.msk.f32.gmra.mrb[26].mxu1 %vm357_vm1, %v4980_v38  ;;  %4040 = vmatmul.mubr.msk.f32.gmra.mrb[10].mxu0 %vm357_vm1, %v4983_v13  ;;  %5864 = vst [vmem:[#allocation39_spill] sm:$0xff] %v5018_v57  ;;  %v980_v38 = vrot.slane %v4741_v17, 2  ;;  %v5022_v13 = vsel %vm936_vm2, %v977_v34, %v978_v33  ;;  %5865 = vst [vmem:[#allocation40_spill] sm:$0xff] %v5033_v37  ;;  %v988_v34 = vrot.slane %v4792_v55, 2 }
  0x4e   : > { %3816 = vmatprep.mubr.msk.f32.mxu1 %vm357_vm1, %v4989_v14  ;;  %4042 = vmatprep.mubr.msk.f32.mxu0 %vm357_vm1, %v4998_v39  ;;  %v982_v14 = vrot.slane %v4761_v28, 2  ;;  %v5055_v45 = vsel %vm936_vm2, %v983_v27, %v985_v49 }
  0x4f   : > { %v5038_v17 = vsel %vm936_vm2, %v978_v33, %v980_v38  ;;  %v5059_v0 = vsel %vm936_vm2, %v987_v62, %v988_v34  ;;  %v992_v38 = vrot.slane %v4821_v22, 2  ;;  %v993_v33 = vrot.slane %v4824_v24, 2 }
  0x50   : > { %v5042_v61 = vsel %vm936_vm2, %v982_v14, %v983_v27  ;;  %v990_v14 = vrot.slane %v4813_v16, 2  ;;  %v995_v27 = vrot.slane %v4854_v56, 2  ;;  %v997_v62 = vrot.slane %v4862_v8, 2 }
  0x51   : > { %3817 = vmatmul.mubr.msk.f32.gmra.mrb[28].mxu1 %vm357_vm1, %v5009_v2  ;;  %4043 = vmatmul.mubr.msk.f32.gmra.mrb[12].mxu0 %vm357_vm1, %v5015_v41  ;;  %v5082_v49 = vsel %vm936_vm2, %v992_v38, %v993_v33  ;;  %v1002_v38 = vrot.slane %v4898_v46, 2  ;;  %v1013_v2 = vrot.slane %v4971_v44, 2 }
  0x52   : > { %3819 = vmatprep.mubr.msk.f32.mxu1 %vm357_vm1, %v5018_v57  ;;  %4045 = vmatprep.mubr.msk.f32.mxu0 %vm357_vm1, %v5022_v13  ;;  %v5078_v16 = vsel %vm936_vm2, %v988_v34, %v990_v14  ;;  %5866 = vst [vmem:[#allocation41_spill] sm:$0xff] %v5082_v49  ;;  %v5096_v56 = vsel %vm936_vm2, %v993_v33, %v995_v27  ;;  %v1000_v34 = vrot.slane %v4890_v52, 2  ;;  %v1005_v33 = vrot.slane %v4925_v36, 2 }
  0x53   : > { %v1008_v57 = vrot.slane %v4936_v54, 2 }
  0x55   : > { %3820 = vmatmul.mubr.msk.f32.gmra.mrb[30].mxu1 %vm357_vm1, %v5033_v37  ;;  %4046 = vmatmul.mubr.msk.f32.gmra.mrb[14].mxu0 %vm357_vm1, %v5038_v17  ;;  %v1003_v37 = vrot.slane %v4901_v12, 2 }
  0x56   : > { %3824 = vmatprep.mubr.msk.f32.mxu1 %vm357_vm1, %v4550_v4  ;;  %4048 = vmatprep.mubr.msk.f32.mxu0 %vm357_vm1, %v5042_v61 }
  0x57   : > { %v5117_v27 = vsel %vm936_vm2, %v1002_v38, %v1003_v37  ;;  %v5130_v36 = vsel %vm936_vm2, %v1003_v37, %v1005_v33  ;;  %v1012_v38 = vrot.slane %v4968_v40, 2  ;;  %v1015_v37 = vrot.slane %v4995_v48, 2 }
  0x58   : > { %5868 = vst [vmem:[#allocation43_spill] sm:$0xff] %v5117_v27  ;;  %5869 = vst [vmem:[#allocation44_spill] sm:$0xff] %v5130_v36 }
  0x59   : > { %3825 = vmatmul.mubr.msk.f32.vlgmr.msra.gmra.mrb[0].mxu1 %vm357_vm1, %v4553_v5  ;;  %4049 = vmatmul.mubr.msk.f32.gmra.mrb[16].mxu0 %vm357_vm1, %v5055_v45  ;;  %v5157_v33 = vsel %vm936_vm2, %v1012_v38, %v1013_v2  ;;  %v5173_v48 = vsel %vm936_vm2, %v1013_v2, %v1015_v37  ;;  %v938_v38 = vrot.slane %v4553_v5, 2  ;;  %v940_v37 = vrot.slane %v4565_v11, 2  ;;  %v5876_v5 = vld [vmem:[#allocation20_spill] sm:$0xff]  ;;  %v5877_v11 = vld [vmem:[#allocation22_spill] sm:$0xff] }
  0x5a   : > { %3873 = vmatpush3.msra.mxu1 %v4621_v35  ;;  %3827 = vmatprep.mubr.msk.f32.mxu1 %vm357_vm1, %v4556_v6  ;;  %v998_v35 = vrot.slane %v4865_v10, 2  ;;  %v5144_v6 = vld [vmem:[%s4547_s25 + $0x188] sm:$0xff]  ;;  %5872 = vst [vmem:[#allocation47_spill] sm:$0xff] %v5157_v33  ;;  %5873 = vst [vmem:[#allocation48_spill] sm:$0xff] %v5173_v48 }
  0x5b   : > { %4051 = vmatprep.mubr.msk.f32.mxu0 %vm357_vm1, %v5059_v0  ;;  %3922 = vmatprep.subr.mxu1 %v5068_v23 }
  0x5c   : > { %v5100_v14 = vsel %vm936_vm2, %v997_v62, %v998_v35  ;;  %v5113_v52 = vsel %vm936_vm2, %v998_v35, %v1000_v34  ;;  %v1007_v62 = vrot.slane %v4933_v20, 2  ;;  %v1010_v35 = vrot.slane %v4960_v60, 2 }
  0x5d   : > { %3828 = vmatmul.mubr.msk.f32.gmra.mrb[2].mxu1 %vm357_vm1, %v4561_v9  ;;  %4052 = vmatmul.mubr.msk.f32.gmra.mrb[18].mxu0 %vm357_vm1, %v5078_v16  ;;  %5867 = vst [vmem:[#allocation42_spill] sm:$0xff] %v5113_v52  ;;  %v5141_v9 = vld [vmem:[%s4547_s25 + $0x180] sm:$0xff] }
  0x5e   : > { %3830 = vmatprep.mubr.msk.f32.mxu1 %vm357_vm1, %v4573_v15  ;;  %4054 = vmatprep.mubr.msk.f32.mxu0 %vm357_vm1, %v5082_v49  ;;  %v5134_v34 = vsel %vm936_vm2, %v1007_v62, %v1008_v57  ;;  %v5153_v60 = vsel %vm936_vm2, %v1008_v57, %v1010_v35  ;;  %v1874_v62 = vrot.slane %v5141_v9, 2 }
  0x5f   : > { %5870 = vst [vmem:[#allocation45_spill] sm:$0xff] %v5134_v34  ;;  %5871 = vst [vmem:[#allocation46_spill] sm:$0xff] %v5153_v60 }
  0x61   : > { %3831 = vmatmul.mubr.msk.f32.gmra.mrb[4].mxu1 %vm357_vm1, %v4578_v18  ;;  %4055 = vmatmul.mubr.msk.f32.gmra.mrb[20].mxu0 %vm357_vm1, %v5096_v56 }
  0x62   : > { %3833 = vmatprep.mubr.msk.f32.mxu1 %vm357_vm1, %v4590_v25  ;;  %4057 = vmatprep.mubr.msk.f32.mxu0 %vm357_vm1, %v5100_v14 }
  0x65   : > { %3834 = vmatmul.mubr.msk.f32.gmra.mrb[6].mxu1 %vm357_vm1, %v4593_v26  ;;  %4058 = vmatmul.mubr.msk.f32.gmra.mrb[22].mxu0 %vm357_vm1, %v5113_v52  ;;  %v5162_v52 = vld [vmem:[%s4547_s25 + $0x190] sm:$0x3] }
  0x66   : > { %3836 = vmatprep.mubr.msk.f32.mxu1 %vm357_vm1, %v4604_v31  ;;  %4060 = vmatprep.mubr.msk.f32.mxu0 %vm357_vm1, %v5117_v27  ;;  %v1875_v27 = vrot.slane %v5144_v6, 2  ;;  %v1877_v57 = vrot.slane %v5162_v52, 2 }
  0x68   : > { %v5177_v35 = vsel %vm936_vm2, %v1874_v62, %v1875_v27  ;;  %v5188_v2 = vsel %vm936_vm2, %v1875_v27, %v1877_v57  ;;  %v5203_v27 = vld [vmem:[%s5751_s1 + $0x40] sm:$0xff] }
  0x69   : > { %3837 = vmatmul.mubr.msk.f32.gmra.mrb[8].mxu1 %vm357_vm1, %v4607_v32  ;;  %4061 = vmatmul.mubr.msk.f32.gmra.mrb[24].mxu0 %vm357_vm1, %v5130_v36  ;;  %5874 = vst [vmem:[#allocation49_spill] sm:$0xff] %v5177_v35  ;;  %5875 = vst [vmem:[#allocation50_spill] sm:$0xff] %v5188_v2  ;;  %v5881_v57 = vld [vmem:[#allocation30_spill] sm:$0xff] }
  0x6a   : > { %3839 = vmatprep.mubr.msk.f32.mxu1 %vm357_vm1, %v4641_v42  ;;  %4063 = vmatprep.mubr.msk.f32.mxu0 %vm357_vm1, %v5134_v34 }
  0x6d   : > { %3840 = vmatmul.mubr.msk.f32.gmra.mrb[10].mxu1 %vm357_vm1, %v4644_v43  ;;  %4064 = vmatmul.mubr.msk.f32.gmra.mrb[26].mxu0 %vm357_vm1, %v5153_v60 }
  0x6e   : > { %3842 = vmatprep.mubr.msk.f32.mxu1 %vm357_vm1, %v4668_v50  ;;  %4066 = vmatprep.mubr.msk.f32.mxu0 %vm357_vm1, %v5157_v33 }
  0x71   : > { %3843 = vmatmul.mubr.msk.f32.gmra.mrb[12].mxu1 %vm357_vm1, %v4671_v51  ;;  %4067 = vmatmul.mubr.msk.f32.gmra.mrb[28].mxu0 %vm357_vm1, %v5173_v48 }
  0x72   : > { %3845 = vmatprep.mubr.msk.f32.mxu1 %vm357_vm1, %v4694_v58  ;;  %4069 = vmatprep.mubr.msk.f32.mxu0 %vm357_vm1, %v5177_v35  ;;  %v5886_v35 = vld [vmem:[#allocation6_spill] sm:$0xff] }
  0x75   : > { %3846 = vmatmul.mubr.msk.f32.gmra.mrb[14].mxu1 %vm357_vm1, %v4697_v59  ;;  %4070 = vmatmul.mubr.msk.f32.gmra.mrb[30].mxu0 %vm357_vm1, %v5188_v2  ;;  %v5885_v2 = vld [vmem:[#allocation5_spill] sm:$0xff] }
  0x76   : > { %3848 = vmatprep.mubr.msk.f32.mxu1 %vm357_vm1, %v4720_v3  ;;  %4074 = vmatprep.mubr.msk.f32.mxu0 %vm357_vm1, %v4573_v15 }
  0x79   : > { %3849 = vmatmul.mubr.msk.f32.gmra.mrb[16].mxu1 %vm357_vm1, %v4723_v7  ;;  %4075 = vmatmul.mubr.msk.f32.vlgmr.msra.gmra.mrb[0].mxu0 %vm357_vm1, %v4578_v18 }
  0x7a   : > { %3851 = vmatprep.mubr.msk.f32.mxu1 %vm357_vm1, %v4761_v28  ;;  %4123 = vmatpush3.msra.mxu0 %v4831_v30  ;;  %v937_v30 = vrot.slane %v4550_v4, 2  ;;  %v941_v4 = vsel %vm936_vm2, %v938_v38, %v940_v37  ;;  %v5883_v37 = vld [vmem:[#allocation36_spill] sm:$0xff] }
  0x7b   : > { %4077 = vmatprep.mubr.msk.f32.mxu0 %vm357_vm1, %v4590_v25  ;;  %4172 = vmatprep.subr.mxu0 %v5203_v27 }
  0x7c   : > { %v939_v62 = vsel %vm936_vm2, %v937_v30, %v938_v38  ;;  %v5882_v30 = vld [vmem:[#allocation32_spill] sm:$0xff]  ;;  %v5323_v38 = vld [vmem:[%s4547_s25 + $0x198] sm:$0xff] }
  0x7d   : > { %3852 = vmatmul.mubr.msk.f32.gmra.mrb[18].mxu1 %vm357_vm1, %v4764_v29  ;;  %4078 = vmatmul.mubr.msk.f32.gmra.mrb[2].mxu0 %vm357_vm1, %v4593_v26 }
  0x7e   : > { %3854 = vmatprep.mubr.msk.f32.mxu1 %vm357_vm1, %v4789_v53  ;;  %4080 = vmatprep.mubr.msk.f32.mxu0 %vm357_vm1, %v4604_v31 }
  0x81   : > { %3855 = vmatmul.mubr.msk.f32.gmra.mrb[20].mxu1 %vm357_vm1, %v4792_v55  ;;  %4081 = vmatmul.mubr.msk.f32.gmra.mrb[4].mxu0 %vm357_vm1, %v4607_v32 }
  0x82   : > { %3857 = vmatprep.mubr.msk.f32.mxu1 %vm357_vm1, %v4821_v22  ;;  %4083 = vmatprep.mubr.msk.f32.mxu0 %vm357_vm1, %v4641_v42 }
  0x85   : > { %3858 = vmatmul.mubr.msk.f32.gmra.mrb[22].mxu1 %vm357_vm1, %v4824_v24  ;;  %4084 = vmatmul.mubr.msk.f32.gmra.mrb[6].mxu0 %vm357_vm1, %v4644_v43 }
  0x86   : > { %3860 = vmatprep.mubr.msk.f32.mxu1 %vm357_vm1, %v4862_v8  ;;  %4086 = vmatprep.mubr.msk.f32.mxu0 %vm357_vm1, %v4668_v50 }
  0x89   : > { %3861 = vmatmul.mubr.msk.f32.gmra.mrb[24].mxu1 %vm357_vm1, %v4865_v10  ;;  %4087 = vmatmul.mubr.msk.f32.gmra.mrb[8].mxu0 %vm357_vm1, %v4671_v51 }
  0x8a   : > { %3863 = vmatprep.mubr.msk.f32.mxu1 %vm357_vm1, %v4898_v46  ;;  %4089 = vmatprep.mubr.msk.f32.mxu0 %vm357_vm1, %v4694_v58 }
  0x8d   : > { %3864 = vmatmul.mubr.msk.f32.gmra.mrb[26].mxu1 %vm357_vm1, %v4901_v12  ;;  %4090 = vmatmul.mubr.msk.f32.gmra.mrb[10].mxu0 %vm357_vm1, %v4697_v59 }
  0x8e   : > { %3866 = vmatprep.mubr.msk.f32.mxu1 %vm357_vm1, %v4933_v20  ;;  %4092 = vmatprep.mubr.msk.f32.mxu0 %vm357_vm1, %v4720_v3 }
  0x91   : > { %3867 = vmatmul.mubr.msk.f32.gmra.mrb[28].mxu1 %vm357_vm1, %v4936_v54  ;;  %4093 = vmatmul.mubr.msk.f32.gmra.mrb[12].mxu0 %vm357_vm1, %v4723_v7 }
  0x92   : > { %3869 = vmatprep.mubr.msk.f32.mxu1 %vm357_vm1, %v4968_v40  ;;  %4095 = vmatprep.mubr.msk.f32.mxu0 %vm357_vm1, %v4761_v28 }
  0x95   : > { %3870 = vmatmul.mubr.msk.f32.gmra.mrb[30].mxu1 %vm357_vm1, %v4971_v44  ;;  %4096 = vmatmul.mubr.msk.f32.gmra.mrb[14].mxu0 %vm357_vm1, %v4764_v29 }
  0x96   : > { %3874 = vmatprep.mubr.msk.f32.mxu1 %vm357_vm1, %v939_v62  ;;  %4098 = vmatprep.mubr.msk.f32.mxu0 %vm357_vm1, %v4789_v53  ;;  %v5334_v62 = vld [vmem:[%s4547_s25 + $0x1a0] sm:$0xff] }
  0x99   : > { %3875 = vmatmul.mubr.msk.f32.vlgmr.msra.gmra.mrb[0].mxu1 %vm357_vm1, %v941_v4  ;;  %4099 = vmatmul.mubr.msk.f32.gmra.mrb[16].mxu0 %vm357_vm1, %v4792_v55  ;;  %v5884_v4 = vld [vmem:[#allocation4_spill] sm:$0xff] }
  0x9a   : > { %3923 = vmatpush3.msra.mxu1 %v5068_v23  ;;  %3877 = vmatprep.mubr.msk.f32.mxu1 %vm357_vm1, %v4784_v47  ;;  %v5878_v47 = vld [vmem:[#allocation24_spill] sm:$0xff] }
  0x9b   : > { %4101 = vmatprep.mubr.msk.f32.mxu0 %vm357_vm1, %v4821_v22  ;;  %4222 = vmatprep.subr.mxu1 %v4531_v1  ;;  %v5880_v23 = vld [vmem:[#allocation28_spill] sm:$0xff] }
  0x9d   : > { %3878 = vmatmul.mubr.msk.f32.gmra.mrb[2].mxu1 %vm357_vm1, %v4805_v63  ;;  %4102 = vmatmul.mubr.msk.f32.gmra.mrb[18].mxu0 %vm357_vm1, %v4824_v24  ;;  %v5879_v63 = vld [vmem:[#allocation26_spill] sm:$0xff] }
  0x9e   : > { %3880 = vmatprep.mubr.msk.f32.mxu1 %vm357_vm1, %v4816_v21  ;;  %4104 = vmatprep.mubr.msk.f32.mxu0 %vm357_vm1, %v4862_v8 }
  0xa1   : > { %3881 = vmatmul.mubr.msk.f32.gmra.mrb[4].mxu1 %vm357_vm1, %v5876_v5  ;;  %4105 = vmatmul.mubr.msk.f32.gmra.mrb[20].mxu0 %vm357_vm1, %v4865_v10 }
  0xa2   : > { %3883 = vmatprep.mubr.msk.f32.mxu1 %vm357_vm1, %v5877_v11  ;;  %4107 = vmatprep.mubr.msk.f32.mxu0 %vm357_vm1, %v4898_v46 }
  0xa5   : > { %3884 = vmatmul.mubr.msk.f32.gmra.mrb[6].mxu1 %vm357_vm1, %v5878_v47  ;;  %4108 = vmatmul.mubr.msk.f32.gmra.mrb[22].mxu0 %vm357_vm1, %v4901_v12 }
  0xa6   : > { %3886 = vmatprep.mubr.msk.f32.mxu1 %vm357_vm1, %v5879_v63  ;;  %4110 = vmatprep.mubr.msk.f32.mxu0 %vm357_vm1, %v4933_v20 }
  0xa9   : > { %3887 = vmatmul.mubr.msk.f32.gmra.mrb[8].mxu1 %vm357_vm1, %v5880_v23  ;;  %4111 = vmatmul.mubr.msk.f32.gmra.mrb[24].mxu0 %vm357_vm1, %v4936_v54 }
  0xaa   : > { %3889 = vmatprep.mubr.msk.f32.mxu1 %vm357_vm1, %v5881_v57  ;;  %4113 = vmatprep.mubr.msk.f32.mxu0 %vm357_vm1, %v4968_v40 }
  0xad   : > { %3890 = vmatmul.mubr.msk.f32.gmra.mrb[10].mxu1 %vm357_vm1, %v5882_v30  ;;  %4114 = vmatmul.mubr.msk.f32.gmra.mrb[26].mxu0 %vm357_vm1, %v4971_v44  ;;  %v5887_v44 = vld [vmem:[#allocation7_spill] sm:$0xff] }
  0xae   : > { %3892 = vmatprep.mubr.msk.f32.mxu1 %vm357_vm1, %v4963_v19  ;;  %4116 = vmatprep.mubr.msk.f32.mxu0 %vm357_vm1, %v5141_v9 }
  0xb1   : > { %3893 = vmatmul.mubr.msk.f32.gmra.mrb[12].mxu1 %vm357_vm1, %v5883_v37  ;;  %4117 = vmatmul.mubr.msk.f32.gmra.mrb[28].mxu0 %vm357_vm1, %v5144_v6 }
  0xb2   : > { %3895 = vmatprep.mubr.msk.f32.mxu1 %vm357_vm1, %v4998_v39  ;;  %4119 = vmatprep.mubr.msk.f32.mxu0 %vm357_vm1, %v5323_v38 }
  0xb5   : > { %3896 = vmatmul.mubr.msk.f32.gmra.mrb[14].mxu1 %vm357_vm1, %v5015_v41  ;;  %4120 = vmatmul.mubr.msk.f32.gmra.mrb[30].mxu0 %vm357_vm1, %v5334_v62 }
  0xb6   : > { %3898 = vmatprep.mubr.msk.f32.mxu1 %vm357_vm1, %v5022_v13  ;;  %4124 = vmatprep.mubr.msk.f32.mxu0 %vm357_vm1, %v5884_v4  ;;  %v5888_v4 = vld [vmem:[#allocation8_spill] sm:$0xff] }
  0xb9   : > { %3899 = vmatmul.mubr.msk.f32.gmra.mrb[16].mxu1 %vm357_vm1, %v5038_v17  ;;  %4125 = vmatmul.mubr.msk.f32.vlgmr.msra.gmra.mrb[0].mxu0 %vm357_vm1, %v5885_v2  ;;  %v5889_v2 = vld [vmem:[#allocation9_spill] sm:$0xff] }
  0xba   : > { %3901 = vmatprep.mubr.msk.f32.mxu1 %vm357_vm1, %v5042_v61  ;;  %4173 = vmatpush3.msra.mxu0 %v5203_v27  ;;  %v5892_v27 = vld [vmem:[#allocation12_spill] sm:$0xff] }
  0xbb   : > { %4127 = vmatprep.mubr.msk.f32.mxu0 %vm357_vm1, %v5886_v35  ;;  %v5890_v35 = vld [vmem:[#allocation10_spill] sm:$0xff] }
  0xbd   : > { %3902 = vmatmul.mubr.msk.f32.gmra.mrb[18].mxu1 %vm357_vm1, %v5055_v45  ;;  %4128 = vmatmul.mubr.msk.f32.gmra.mrb[2].mxu0 %vm357_vm1, %v5887_v44  ;;  %v5891_v44 = vld [vmem:[#allocation11_spill] sm:$0xff] }
  0xbe   : > { %3904 = vmatprep.mubr.msk.f32.mxu1 %vm357_vm1, %v5059_v0  ;;  %4130 = vmatprep.mubr.msk.f32.mxu0 %vm357_vm1, %v5888_v4  ;;  %v5893_v4 = vld [vmem:[#allocation42_spill] sm:$0xff] }
  0xc1   : > { %3905 = vmatmul.mubr.msk.f32.gmra.mrb[20].mxu1 %vm357_vm1, %v5078_v16  ;;  %4131 = vmatmul.mubr.msk.f32.gmra.mrb[4].mxu0 %vm357_vm1, %v5889_v2  ;;  %v5894_v2 = vld [vmem:[#allocation13_spill] sm:$0xff] }
  0xc2   : > { %3907 = vmatprep.mubr.msk.f32.mxu1 %vm357_vm1, %v5082_v49  ;;  %4133 = vmatprep.mubr.msk.f32.mxu0 %vm357_vm1, %v5890_v35  ;;  %v5895_v49 = vld [vmem:[#allocation43_spill] sm:$0xff]  ;;  %v5896_v35 = vld [vmem:[#allocation14_spill] sm:$0xff] }
  0xc5   : > { %3908 = vmatmul.mubr.msk.f32.gmra.mrb[22].mxu1 %vm357_vm1, %v5096_v56  ;;  %4134 = vmatmul.mubr.msk.f32.gmra.mrb[6].mxu0 %vm357_vm1, %v5891_v44  ;;  %v5897_v44 = vld [vmem:[#allocation15_spill] sm:$0xff] }
  0xc6   : > { %3910 = vmatprep.mubr.msk.f32.mxu1 %vm357_vm1, %v5100_v14  ;;  %4136 = vmatprep.mubr.msk.f32.mxu0 %vm357_vm1, %v5892_v27  ;;  %v5898_v27 = vld [vmem:[#allocation16_spill] sm:$0xff] }
  0xc9   : > { %3911 = vmatmul.mubr.msk.f32.gmra.mrb[24].mxu1 %vm357_vm1, %v5893_v4  ;;  %4137 = vmatmul.mubr.msk.f32.gmra.mrb[8].mxu0 %vm357_vm1, %v5894_v2  ;;  %v5899_v2 = vld [vmem:[#allocation17_spill] sm:$0xff] }
  0xca   : > { %3913 = vmatprep.mubr.msk.f32.mxu1 %vm357_vm1, %v5895_v49  ;;  %4139 = vmatprep.mubr.msk.f32.mxu0 %vm357_vm1, %v5896_v35  ;;  %v5900_v35 = vld [vmem:[#allocation18_spill] sm:$0xff] }
  0xcd   : > { %3914 = vmatmul.mubr.msk.f32.gmra.mrb[26].mxu1 %vm357_vm1, %v5130_v36  ;;  %4140 = vmatmul.mubr.msk.f32.gmra.mrb[10].mxu0 %vm357_vm1, %v5897_v44  ;;  %v5901_v44 = vld [vmem:[#allocation19_spill] sm:$0xff] }
  0xce   : > { %3916 = vmatprep.mubr.msk.f32.mxu1 %vm357_vm1, %v5134_v34  ;;  %4142 = vmatprep.mubr.msk.f32.mxu0 %vm357_vm1, %v5898_v27  ;;  %v5902_v34 = vld [vmem:[#allocation2_spill] sm:$0xff]  ;;  %v5903_v27 = vld [vmem:[#allocation21_spill] sm:$0xff]  ;;  %v5459_v36 = vld [vmem:[%s4547_s25 + $0x1a8] sm:$0x3] }
  0xd1   : > { %3917 = vmatmul.mubr.msk.f32.gmra.mrb[28].mxu1 %vm357_vm1, %v5153_v60  ;;  %4143 = vmatmul.mubr.msk.f32.gmra.mrb[12].mxu0 %vm357_vm1, %v5899_v2  ;;  %v5904_v60 = vld [vmem:[#allocation3_spill] sm:$0xff] }
  0xd2   : > { %3919 = vmatprep.mubr.msk.f32.mxu1 %vm357_vm1, %v5157_v33  ;;  %4145 = vmatprep.mubr.msk.f32.mxu0 %vm357_vm1, %v5900_v35  ;;  %v5905_v2 = vld [vmem:[#allocation23_spill] sm:$0xff]  ;;  %v5913_v33 = vld [vmem:[#allocation38_spill] sm:$0xff] }
  0xd5   : > { %3920 = vmatmul.mubr.msk.f32.gmra.mrb[30].mxu1 %vm357_vm1, %v5173_v48  ;;  %4146 = vmatmul.mubr.msk.f32.gmra.mrb[14].mxu0 %vm357_vm1, %v5901_v44  ;;  %v5906_v48 = vld [vmem:[#allocation25_spill] sm:$0xff] }
  0xd6   : > { %3924 = vmatprep.mubr.msk.f32.mxu1 %vm357_vm1, %v5902_v34  ;;  %4148 = vmatprep.mubr.msk.f32.mxu0 %vm357_vm1, %v5903_v27  ;;  %v5907_v34 = vld [vmem:[#allocation27_spill] sm:$0xff] }
  0xd9   : > { %3925 = vmatmul.mubr.msk.f32.vlgmr.msra.gmra.mrb[0].mxu1 %vm357_vm1, %v5904_v60  ;;  %4149 = vmatmul.mubr.msk.f32.gmra.mrb[16].mxu0 %vm357_vm1, %v5905_v2  ;;  %v5908_v60 = vld [vmem:[#allocation29_spill] sm:$0xff] }
  0xda   : > { %4223 = vmatpush3.msra.mxu1 %v4531_v1  ;;  %3927 = vmatprep.mubr.msk.f32.mxu1 %vm357_vm1, %v4573_v15  ;;  %v5909_v1 = vld [vmem:[#allocation31_spill] sm:$0xff]  ;;  %v5910_v15 = vld [vmem:[#allocation33_spill] sm:$0xff] }
  0xdb   : > { %4151 = vmatprep.mubr.msk.f32.mxu0 %vm357_vm1, %v5906_v48 }
  0xdd   : > { %3928 = vmatmul.mubr.msk.f32.gmra.mrb[2].mxu1 %vm357_vm1, %v4578_v18  ;;  %4152 = vmatmul.mubr.msk.f32.gmra.mrb[18].mxu0 %vm357_vm1, %v5907_v34  ;;  %v5911_v18 = vld [vmem:[#allocation35_spill] sm:$0xff] }
  0xde   : > { %3930 = vmatprep.mubr.msk.f32.mxu1 %vm357_vm1, %v4590_v25  ;;  %4154 = vmatprep.mubr.msk.f32.mxu0 %vm357_vm1, %v5908_v60  ;;  %v5912_v25 = vld [vmem:[#allocation37_spill] sm:$0xff] }
  0xe1   : > { %3931 = vmatmul.mubr.msk.f32.gmra.mrb[4].mxu1 %vm357_vm1, %v4593_v26  ;;  %4155 = vmatmul.mubr.msk.f32.gmra.mrb[20].mxu0 %vm357_vm1, %v5909_v1  ;;  %v1606_v26 = vrot.slane %v5141_v9, 1 }
  0xe2   : > { %3933 = vmatprep.mubr.msk.f32.mxu1 %vm357_vm1, %v4604_v31  ;;  %4157 = vmatprep.mubr.msk.f32.mxu0 %vm357_vm1, %v5910_v15  ;;  %v1607_v31 = vrot.slane %v5144_v6, 1 }
  0xe4   : > { %v5456_v15 = vsel %vm274_vm0, %v1606_v26, %v1607_v31 }
  0xe5   : > { %3934 = vmatmul.mubr.msk.f32.gmra.mrb[6].mxu1 %vm357_vm1, %v4607_v32  ;;  %4158 = vmatmul.mubr.msk.f32.gmra.mrb[22].mxu0 %vm357_vm1, %v5911_v18  ;;  %v5914_v32 = vld [vmem:[#allocation39_spill] sm:$0xff]  ;;  %v2409_v18 = vrot.slane %v5334_v62, 1 }
  0xe6   : > { %3936 = vmatprep.mubr.msk.f32.mxu1 %vm357_vm1, %v4641_v42  ;;  %4160 = vmatprep.mubr.msk.f32.mxu0 %vm357_vm1, %v5912_v25  ;;  %v1609_v42 = vrot.slane %v5162_v52, 1  ;;  %v2408_v25 = vrot.slane %v5323_v38, 1  ;;  %v2411_v52 = vrot.slane %v5459_v36, 1 }
  0xe8   : > { %v2410_v26 = vsel %vm274_vm0, %v2408_v25, %v2409_v18 }
  0xe9   : > { %3937 = vmatmul.mubr.msk.f32.gmra.mrb[8].mxu1 %vm357_vm1, %v4644_v43  ;;  %4161 = vmatmul.mubr.msk.f32.gmra.mrb[24].mxu0 %vm357_vm1, %v5913_v33  ;;  %v5915_v43 = vld [vmem:[#allocation40_spill] sm:$0xff] }
  0xea   : > { %3939 = vmatprep.mubr.msk.f32.mxu1 %vm357_vm1, %v4668_v50  ;;  %4163 = vmatprep.mubr.msk.f32.mxu0 %vm357_vm1, %v5914_v32  ;;  %v5470_v50 = vsel %vm274_vm0, %v1607_v31, %v1609_v42 }
  0xed   : > { %3940 = vmatmul.mubr.msk.f32.gmra.mrb[10].mxu1 %vm357_vm1, %v4671_v51  ;;  %4164 = vmatmul.mubr.msk.f32.gmra.mrb[26].mxu0 %vm357_vm1, %v5915_v43  ;;  %v2412_v51 = vsel %vm274_vm0, %v2409_v18, %v2411_v52 }
  0xee   : > { %3942 = vmatprep.mubr.msk.f32.mxu1 %vm357_vm1, %v4694_v58  ;;  %4166 = vmatprep.mubr.msk.f32.mxu0 %vm357_vm1, %v5456_v15  ;;  %v5919_v58 = vld [vmem:[#allocation33_spill] sm:$0xff] }
  0xf1   : > { %3943 = vmatmul.mubr.msk.f32.gmra.mrb[12].mxu1 %vm357_vm1, %v4697_v59  ;;  %4167 = vmatmul.mubr.msk.f32.gmra.mrb[28].mxu0 %vm357_vm1, %v5470_v50  ;;  %v5920_v59 = vld [vmem:[#allocation45_spill] sm:$0xff] }
  0xf2   : > { %3945 = vmatprep.mubr.msk.f32.mxu1 %vm357_vm1, %v4720_v3  ;;  %4169 = vmatprep.mubr.msk.f32.mxu0 %vm357_vm1, %v2410_v26  ;;  %v5921_v3 = vld [vmem:[#allocation35_spill] sm:$0xff] }
  0xf5   : > { %3946 = vmatmul.mubr.msk.f32.gmra.mrb[14].mxu1 %vm357_vm1, %v4723_v7  ;;  %4170 = vmatmul.mubr.msk.f32.gmra.mrb[30].mxu0 %vm357_vm1, %v2412_v51  ;;  %v5922_v7 = vld [vmem:[#allocation46_spill] sm:$0xff] }
  0xf6   : > { %3948 = vmatprep.mubr.msk.f32.mxu1 %vm357_vm1, %v4761_v28  ;;  %4174 = vmatprep.mubr.msk.f32.mxu0 %vm357_vm1, %v4816_v21  ;;  %v2676_v28 = vrot.slane %v5323_v38, 2  ;;  %v2679_v21 = vrot.slane %v5459_v36, 2 }
  0xf9   : > { %3949 = vmatmul.mubr.msk.f32.gmra.mrb[16].mxu1 %vm357_vm1, %v4764_v29  ;;  %4175 = vmatmul.mubr.msk.f32.vlgmr.msra.gmra.mrb[0].mxu0 %vm357_vm1, %v5876_v5  ;;  %v2677_v29 = vrot.slane %v5334_v62, 2 }
  0xfa   : > { %3951 = vmatprep.mubr.msk.f32.mxu1 %vm357_vm1, %v4789_v53  ;;  %4177 = vmatprep.mubr.msk.f32.mxu0 %vm357_vm1, %v5877_v11  ;;  %v5925_v53 = vld [vmem:[#allocation48_spill] sm:$0xff] }
  0xfd   : > { %3952 = vmatmul.mubr.msk.f32.gmra.mrb[18].mxu1 %vm357_vm1, %v4792_v55  ;;  %4178 = vmatmul.mubr.msk.f32.gmra.mrb[2].mxu0 %vm357_vm1, %v5878_v47  ;;  %v5926_v55 = vld [vmem:[#allocation49_spill] sm:$0xff] }
  0xfe   : > { %3954 = vmatprep.mubr.msk.f32.mxu1 %vm357_vm1, %v4821_v22  ;;  %4180 = vmatprep.mubr.msk.f32.mxu0 %vm357_vm1, %v5879_v63  ;;  %v5924_v22 = vld [vmem:[#allocation47_spill] sm:$0xff] }
 0x101   : > { %3955 = vmatmul.mubr.msk.f32.gmra.mrb[20].mxu1 %vm357_vm1, %v4824_v24  ;;  %4181 = vmatmul.mubr.msk.f32.gmra.mrb[4].mxu0 %vm357_vm1, %v5880_v23  ;;  %v2678_v24 = vsel %vm936_vm2, %v2676_v28, %v2677_v29 }
 0x102   : > { %3957 = vmatprep.mubr.msk.f32.mxu1 %vm357_vm1, %v4862_v8  ;;  %4183 = vmatprep.mubr.msk.f32.mxu0 %vm357_vm1, %v5881_v57  ;;  %v5923_v8 = vld [vmem:[#allocation37_spill] sm:$0xff] }
 0x105   : > { %3958 = vmatmul.mubr.msk.f32.gmra.mrb[22].mxu1 %vm357_vm1, %v4865_v10  ;;  %4184 = vmatmul.mubr.msk.f32.gmra.mrb[6].mxu0 %vm357_vm1, %v5882_v30  ;;  %v5927_v10 = vld [vmem:[#allocation50_spill] sm:$0xff] }
 0x106   : > { %3960 = vmatprep.mubr.msk.f32.mxu1 %vm357_vm1, %v4898_v46  ;;  %4186 = vmatprep.mubr.msk.f32.mxu0 %vm357_vm1, %v4963_v19  ;;  %v5916_v46 = vld [vmem:[#allocation34_spill] sm:$0xff] }
 0x109   : > { %3961 = vmatmul.mubr.msk.f32.gmra.mrb[24].mxu1 %vm357_vm1, %v4901_v12  ;;  %4187 = vmatmul.mubr.msk.f32.gmra.mrb[8].mxu0 %vm357_vm1, %v5883_v37  ;;  %v2680_v12 = vsel %vm936_vm2, %v2677_v29, %v2679_v21 }
 0x10a   : > { %3963 = vmatprep.mubr.msk.f32.mxu1 %vm357_vm1, %v4933_v20  ;;  %4189 = vmatprep.mubr.msk.f32.mxu0 %vm357_vm1, %v4998_v39 }
 0x10d   : > { %3964 = vmatmul.mubr.msk.f32.gmra.mrb[26].mxu1 %vm357_vm1, %v4936_v54  ;;  %4190 = vmatmul.mubr.msk.f32.gmra.mrb[10].mxu0 %vm357_vm1, %v5015_v41 }
 0x10e   : > { %3966 = vmatprep.mubr.msk.f32.mxu1 %vm357_vm1, %v4968_v40  ;;  %4192 = vmatprep.mubr.msk.f32.mxu0 %vm357_vm1, %v5022_v13 }
 0x111   : > { %3967 = vmatmul.mubr.msk.f32.gmra.mrb[28].mxu1 %vm357_vm1, %v5916_v46  ;;  %4193 = vmatmul.mubr.msk.f32.gmra.mrb[12].mxu0 %vm357_vm1, %v5038_v17 }
 0x112   : > { %3969 = vmatprep.mubr.msk.f32.mxu1 %vm357_vm1, %v5141_v9  ;;  %4195 = vmatprep.mubr.msk.f32.mxu0 %vm357_vm1, %v5042_v61  ;;  %v5917_v9 = vld [vmem:[#allocation41_spill] sm:$0xff] }
 0x115   : > { %3970 = vmatmul.mubr.msk.f32.gmra.mrb[30].mxu1 %vm357_vm1, %v5144_v6  ;;  %4196 = vmatmul.mubr.msk.f32.gmra.mrb[14].mxu0 %vm357_vm1, %v5055_v45  ;;  %v5918_v6 = vld [vmem:[#allocation44_spill] sm:$0xff] }
 0x116   : > { %3998 = vmatprep.mubr.msk.f32.mxu1 %vm357_vm1, %v5900_v35  ;;  %4198 = vmatprep.mubr.msk.f32.mxu0 %vm357_vm1, %v5059_v0 }
 0x119   : > { %3999 = vmatmul.mubr.msk.f32.vlgmr.msra.gmra.mrb[16].mxu1 %vm357_vm1, %v5901_v44  ;;  %4199 = vmatmul.mubr.msk.f32.gmra.mrb[16].mxu0 %vm357_vm1, %v5078_v16 }
 0x11a   : > { %4001 = vmatprep.mubr.msk.f32.mxu1 %vm357_vm1, %v5903_v27  ;;  %4201 = vmatprep.mubr.msk.f32.mxu0 %vm357_vm1, %v5917_v9 }
 0x11d   : > { %4002 = vmatmul.mubr.msk.f32.gmra.mrb[18].mxu1 %vm357_vm1, %v5905_v2  ;;  %4202 = vmatmul.mubr.msk.f32.gmra.mrb[18].mxu0 %vm357_vm1, %v5096_v56 }
 0x11e   : > { %4004 = vmatprep.mubr.msk.f32.mxu1 %vm357_vm1, %v5906_v48  ;;  %4204 = vmatprep.mubr.msk.f32.mxu0 %vm357_vm1, %v5100_v14  ;;  %v5635_v48 = vld [vmem:[%s5752_s2] ss:$0 sm:$0xff] }
 0x121   : > { %4005 = vmatmul.mubr.msk.f32.gmra.mrb[20].mxu1 %vm357_vm1, %v5907_v34  ;;  %4205 = vmatmul.mubr.msk.f32.gmra.mrb[20].mxu0 %vm357_vm1, %v5893_v4 }
 0x122   : > { %4007 = vmatprep.mubr.msk.f32.mxu1 %vm357_vm1, %v5908_v60  ;;  %4207 = vmatprep.mubr.msk.f32.mxu0 %vm357_vm1, %v5895_v49 }
 0x125   : > { %4008 = vmatmul.mubr.msk.f32.gmra.mrb[22].mxu1 %vm357_vm1, %v5909_v1  ;;  %4208 = vmatmul.mubr.msk.f32.gmra.mrb[22].mxu0 %vm357_vm1, %v5918_v6 }
 0x126   : > { %4010 = vmatprep.mubr.msk.f32.mxu1 %vm357_vm1, %v5919_v58  ;;  %4210 = vmatprep.mubr.msk.f32.mxu0 %vm357_vm1, %v5920_v59 }
 0x129   : > { %4011 = vmatmul.mubr.msk.f32.gmra.mrb[24].mxu1 %vm357_vm1, %v5921_v3  ;;  %4211 = vmatmul.mubr.msk.f32.gmra.mrb[24].mxu0 %vm357_vm1, %v5922_v7 }
 0x12a   : > { %4013 = vmatprep.mubr.msk.f32.mxu1 %vm357_vm1, %v5923_v8  ;;  %4213 = vmatprep.mubr.msk.f32.mxu0 %vm357_vm1, %v5924_v22 }
 0x12d   : > { %4014 = vmatmul.mubr.msk.f32.gmra.mrb[26].mxu1 %vm357_vm1, %v5913_v33  ;;  %4214 = vmatmul.mubr.msk.f32.gmra.mrb[26].mxu0 %vm357_vm1, %v5925_v53 }
 0x12e   : > { %4016 = vmatprep.mubr.msk.f32.mxu1 %vm357_vm1, %v5914_v32  ;;  %4216 = vmatprep.mubr.msk.f32.mxu0 %vm357_vm1, %v5926_v55 }
 0x131   : > { %4017 = vmatmul.mubr.msk.f32.gmra.mrb[28].mxu1 %vm357_vm1, %v5915_v43  ;;  %4217 = vmatmul.mubr.msk.f32.gmra.mrb[28].mxu0 %vm357_vm1, %v5927_v10 }
 0x132   : > { %4019 = vmatprep.mubr.msk.f32.mxu1 %vm357_vm1, %v5456_v15  ;;  %4219 = vmatprep.mubr.msk.f32.mxu0 %vm357_vm1, %v2678_v24 }
 0x135   : > { %4020 = vmatmul.mubr.msk.f32.gmra.mrb[30].mxu1 %vm357_vm1, %v5470_v50  ;;  %4220 = vmatmul.mubr.msk.f32.gmra.mrb[30].mxu0 %vm357_vm1, %v2680_v12 }
 0x1ac   : > { %v3926_v40 = vpop.f32.mrb[0].mxu1 }
 0x1ad   : > { %v1414_v20 = vpop.f32.mrb[1].mxu1 }
 0x1b0   : > { %v3929_v54 = vpop.f32.mrb[2].mxu1 }
 0x1b1   : > { %v1424_v19 = vpop.f32.mrb[3].mxu1 }
 0x1b4   : > { %v3932_v13 = vpop.f32.mrb[4].mxu1 }
 0x1b5   : > { %v1434_v39 = vpop.f32.mrb[5].mxu1 }
 0x1b8   : > { %v3935_v41 = vpop.f32.mrb[6].mxu1 }
 0x1b9   : > { %v1444_v17 = vpop.f32.mrb[7].mxu1 }
 0x1bc   : > { %v5616_v61 = vpop.f32.mrb[8].mxu1 }
 0x1bd   : > { %v5618_v45 = vpop.f32.mrb[9].mxu1 }
 0x1c0   : > { %v5620_v0 = vpop.f32.mrb[10].mxu1 }
 0x1c1   : > { %v5622_v16 = vpop.f32.mrb[11].mxu1 }
 0x1c4   : > { %v5624_v49 = vpop.f32.mrb[12].mxu1 }
 0x1c5   : > { %v5626_v56 = vpop.f32.mrb[13].mxu1 }
 0x1c8   : > { %v5628_v14 = vpop.f32.mrb[14].mxu1 }
 0x1c9   : > { %v5630_v36 = vpop.f32.mrb[15].mxu1 }
 0x1cc   : > { %v4176_v33 = vpop.f32.mrb[0].mxu0 }
 0x1cd   : > { %v4224_v5 = vadd.f32 %v4176_v33, %v3926_v40  ;;  %v2753_v11 = vpop.f32.mrb[1].mxu0 }
 0x1ce   : > { %v4225_v47 = vadd.f32 %v2753_v11, %v1414_v20 }
 0x1cf   : > { %v2952_v63 = vadd.f32 %v4224_v5, %v5635_v48 }
 0x1d0   : > { %v2951_v23 = vadd.f32 %v4225_v47, %v5635_v48  ;;  %v4179_v57 = vpop.f32.mrb[2].mxu0 }
 0x1d1   : > { %vm2984_vm3 = vcmp.ge.f32.partialorder %v2952_v63, 0.0  ;;  %v3016_v30 = vmul.f32 0.1, %v2952_v63  ;;  %v4226_v38 = vadd.f32 %v4179_v57, %v3929_v54  ;;  %v2763_v37 = vpop.f32.mrb[3].mxu0 }
 0x1d2   : > { %vm2983_vm5 = vcmp.ge.f32.partialorder %v2951_v23, 0.0  ;;  %v3015_v62 = vmul.f32 0.1, %v2951_v23  ;;  %v4227_v4 = vadd.f32 %v2763_v37, %v1424_v19 }
 0x1d3   : > { %v3048_v35 = vsel %vm2984_vm3, %v2952_v63, %v3016_v30  ;;  %v2954_v44 = vadd.f32 %v4226_v38, %v5635_v48 }
 0x1d4   : > { %3081 = vst.msk [vmem:[%s5643_s16 + $0x8] sm:$0xff] %vm3079_vm4, %v3048_v35  ;;  %v3047_v27 = vsel %vm2983_vm5, %v2951_v23, %v3015_v62  ;;  %v2953_v2 = vadd.f32 %v4227_v4, %v5635_v48  ;;  %v4182_v34 = vpop.f32.mrb[4].mxu0 }
 0x1d5   : > { %3080 = vst.msk [vmem:[%s5643_s16] sm:$0xff] %vm3079_vm4, %v3047_v27  ;;  %vm2986_vm6 = vcmp.ge.f32.partialorder %v2954_v44, 0.0  ;;  %v3018_v60 = vmul.f32 0.1, %v2954_v44  ;;  %v4228_v1 = vadd.f32 %v4182_v34, %v3932_v13  ;;  %v2773_v15 = vpop.f32.mrb[5].mxu0 }
 0x1d6   : > { %vm2985_vm7 = vcmp.ge.f32.partialorder %v2953_v2, 0.0  ;;  %v3017_v18 = vmul.f32 0.1, %v2953_v2  ;;  %v4229_v25 = vadd.f32 %v2773_v15, %v1434_v39 }
 0x1d7   : > { %v3050_v31 = vsel %vm2986_vm6, %v2954_v44, %v3018_v60  ;;  %v2956_v32 = vadd.f32 %v4228_v1, %v5635_v48 }
 0x1d8   : > { %3083 = vst.msk [vmem:[%s5643_s16 + $0x18] sm:$0xff] %vm3079_vm4, %v3050_v31  ;;  %v3049_v42 = vsel %vm2985_vm7, %v2953_v2, %v3017_v18  ;;  %v2955_v43 = vadd.f32 %v4229_v25, %v5635_v48  ;;  %v4185_v50 = vpop.f32.mrb[6].mxu0 }
 0x1d9   : > { %3082 = vst.msk [vmem:[%s5643_s16 + $0x10] sm:$0xff] %vm3079_vm4, %v3049_v42  ;;  %vm2988_vm8 = vcmp.ge.f32.partialorder %v2956_v32, 0.0  ;;  %v3020_v52 = vmul.f32 0.1, %v2956_v32  ;;  %v4230_v26 = vadd.f32 %v4185_v50, %v3935_v41  ;;  %v2783_v51 = vpop.f32.mrb[7].mxu0 }
 0x1da   : > { %vm2987_vm9 = vcmp.ge.f32.partialorder %v2955_v43, 0.0  ;;  %v3019_v46 = vmul.f32 0.1, %v2955_v43  ;;  %v4231_v9 = vadd.f32 %v2783_v51, %v1444_v17 }
 0x1db   : > { %v3052_v6 = vsel %vm2988_vm8, %v2956_v32, %v3020_v52  ;;  %v2958_v58 = vadd.f32 %v4230_v26, %v5635_v48 }
 0x1dc   : > { %3085 = vst.msk [vmem:[%s5643_s16 + $0x28] sm:$0xff] %vm3079_vm4, %v3052_v6  ;;  %v3051_v59 = vsel %vm2987_vm9, %v2955_v43, %v3019_v46  ;;  %v2957_v3 = vadd.f32 %v4231_v9, %v5635_v48  ;;  %v4188_v7 = vpop.f32.mrb[8].mxu0 }
 0x1dd   : > { %3084 = vst.msk [vmem:[%s5643_s16 + $0x20] sm:$0xff] %vm3079_vm4, %v3051_v59  ;;  %vm2990_vm10 = vcmp.ge.f32.partialorder %v2958_v58, 0.0  ;;  %v3022_v8 = vmul.f32 0.1, %v2958_v58  ;;  %v4232_v22 = vadd.f32 %v4188_v7, %v5616_v61  ;;  %v2793_v28 = vpop.f32.mrb[9].mxu0 }
 0x1de   : > { %vm2989_vm11 = vcmp.ge.f32.partialorder %v2957_v3, 0.0  ;;  %v3021_v29 = vmul.f32 0.1, %v2957_v3  ;;  %v4233_v53 = vadd.f32 %v2793_v28, %v5618_v45 }
 0x1df   : > { %v3054_v55 = vsel %vm2990_vm10, %v2958_v58, %v3022_v8  ;;  %v2960_v21 = vadd.f32 %v4232_v22, %v5635_v48 }
 0x1e0   : > { %3087 = vst.msk [vmem:[%s5643_s16 + $0x38] sm:$0xff] %vm3079_vm4, %v3054_v55  ;;  %v3053_v24 = vsel %vm2989_vm11, %v2957_v3, %v3021_v29  ;;  %v2959_v10 = vadd.f32 %v4233_v53, %v5635_v48  ;;  %v4191_v12 = vpop.f32.mrb[10].mxu0 }
 0x1e1   : > { %3086 = vst.msk [vmem:[%s5643_s16 + $0x30] sm:$0xff] %vm3079_vm4, %v3053_v24  ;;  %vm2992_vm12 = vcmp.ge.f32.partialorder %v2960_v21, 0.0  ;;  %v3024_v40 = vmul.f32 0.1, %v2960_v21  ;;  %v4234_v20 = vadd.f32 %v4191_v12, %v5620_v0  ;;  %v2803_v54 = vpop.f32.mrb[11].mxu0 }
 0x1e2   : > { %vm2991_vm13 = vcmp.ge.f32.partialorder %v2959_v10, 0.0  ;;  %v3023_v19 = vmul.f32 0.1, %v2959_v10  ;;  %v4235_v13 = vadd.f32 %v2803_v54, %v5622_v16 }
 0x1e3   : > { %v3056_v39 = vsel %vm2992_vm12, %v2960_v21, %v3024_v40  ;;  %v2962_v41 = vadd.f32 %v4234_v20, %v5635_v48 }
 0x1e4   : > { %3089 = vst.msk [vmem:[%s5643_s16 + $0x48] sm:$0xff] %vm3079_vm4, %v3056_v39  ;;  %v3055_v17 = vsel %vm2991_vm13, %v2959_v10, %v3023_v19  ;;  %v2961_v61 = vadd.f32 %v4235_v13, %v5635_v48  ;;  %v4194_v45 = vpop.f32.mrb[12].mxu0 }
 0x1e5   : > { %3088 = vst.msk [vmem:[%s5643_s16 + $0x40] sm:$0xff] %vm3079_vm4, %v3055_v17  ;;  %vm2994_vm14 = vcmp.ge.f32.partialorder %v2962_v41, 0.0  ;;  %v3026_v0 = vmul.f32 0.1, %v2962_v41  ;;  %v4236_v33 = vadd.f32 %v4194_v45, %v5624_v49  ;;  %v2813_v5 = vpop.f32.mrb[13].mxu0 }
 0x1e6   : > { %vm2993_vm15 = vcmp.ge.f32.partialorder %v2961_v61, 0.0  ;;  %v3025_v16 = vmul.f32 0.1, %v2961_v61  ;;  %v4237_v11 = vadd.f32 %v2813_v5, %v5626_v56 }
 0x1e7   : > { %v3058_v47 = vsel %vm2994_vm14, %v2962_v41, %v3026_v0  ;;  %v2964_v63 = vadd.f32 %v4236_v33, %v5635_v48 }
 0x1e8   : > { %3091 = vst.msk [vmem:[%s5643_s16 + $0x58] sm:$0xff] %vm3079_vm4, %v3058_v47  ;;  %v3057_v23 = vsel %vm2993_vm15, %v2961_v61, %v3025_v16  ;;  %v2963_v57 = vadd.f32 %v4237_v11, %v5635_v48  ;;  %v4197_v30 = vpop.f32.mrb[14].mxu0 }
 0x1e9   : > { %3090 = vst.msk [vmem:[%s5643_s16 + $0x50] sm:$0xff] %vm3079_vm4, %v3057_v23  ;;  %vm2996_vm0 = vcmp.ge.f32.partialorder %v2964_v63, 0.0  ;;  %v3028_v49 = vmul.f32 0.1, %v2964_v63  ;;  %v4238_v38 = vadd.f32 %v4197_v30, %v5628_v14  ;;  %v2823_v37 = vpop.f32.mrb[15].mxu0 }
 0x1ea   : > { %vm2995_vm1 = vcmp.ge.f32.partialorder %v2963_v57, 0.0  ;;  %v3027_v56 = vmul.f32 0.1, %v2963_v57  ;;  %v4239_v62 = vadd.f32 %v2823_v37, %v5630_v36 }
 0x1eb   : > { %v3060_v4 = vsel %vm2996_vm0, %v2964_v63, %v3028_v49  ;;  %v2966_v35 = vadd.f32 %v4238_v38, %v5635_v48 }
 0x1ec   : > { %v4000_v44 = vpop.f32.mrb[16].mxu1  ;;  %3093 = vst.msk [vmem:[%s5643_s16 + $0x68] sm:$0xff] %vm3079_vm4, %v3060_v4  ;;  %v3059_v27 = vsel %vm2995_vm1, %v2963_v57, %v3027_v56  ;;  %v2965_v2 = vadd.f32 %v4239_v62, %v5635_v48  ;;  %v4200_v34 = vpop.f32.mrb[16].mxu0 }
 0x1ed   : > { %v1763_v60 = vpop.f32.mrb[17].mxu1  ;;  %3092 = vst.msk [vmem:[%s5643_s16 + $0x60] sm:$0xff] %vm3079_vm4, %v3059_v27  ;;  %vm2998_vm2 = vcmp.ge.f32.partialorder %v2966_v35, 0.0  ;;  %v3030_v14 = vmul.f32 0.1, %v2966_v35  ;;  %v4240_v1 = vadd.f32 %v4200_v34, %v4000_v44  ;;  %v2833_v15 = vpop.f32.mrb[17].mxu0 }
 0x1ee   : > { %vm2997_vm3 = vcmp.ge.f32.partialorder %v2965_v2, 0.0  ;;  %v3029_v36 = vmul.f32 0.1, %v2965_v2  ;;  %v4241_v18 = vadd.f32 %v2833_v15, %v1763_v60 }
 0x1ef   : > { %v3062_v25 = vsel %vm2998_vm2, %v2966_v35, %v3030_v14  ;;  %v2968_v31 = vadd.f32 %v4240_v1, %v5635_v48 }
 0x1f0   : > { %v4003_v32 = vpop.f32.mrb[18].mxu1  ;;  %3095 = vst.msk [vmem:[%s5643_s16 + $0x78] sm:$0xff] %vm3079_vm4, %v3062_v25  ;;  %v3061_v42 = vsel %vm2997_vm3, %v2965_v2, %v3029_v36  ;;  %v2967_v43 = vadd.f32 %v4241_v18, %v5635_v48  ;;  %v4203_v50 = vpop.f32.mrb[18].mxu0 }
 0x1f1   : > { %v1773_v52 = vpop.f32.mrb[19].mxu1  ;;  %3094 = vst.msk [vmem:[%s5643_s16 + $0x70] sm:$0xff] %vm3079_vm4, %v3061_v42  ;;  %vm3000_vm5 = vcmp.ge.f32.partialorder %v2968_v31, 0.0  ;;  %v3032_v26 = vmul.f32 0.1, %v2968_v31  ;;  %v4242_v51 = vadd.f32 %v4203_v50, %v4003_v32  ;;  %v2843_v46 = vpop.f32.mrb[19].mxu0 }
 0x1f2   : > { %vm2999_vm6 = vcmp.ge.f32.partialorder %v2967_v43, 0.0  ;;  %v3031_v9 = vmul.f32 0.1, %v2967_v43  ;;  %v4243_v6 = vadd.f32 %v2843_v46, %v1773_v52 }
 0x1f3   : > { %v3064_v58 = vsel %vm3000_vm5, %v2968_v31, %v3032_v26  ;;  %v2970_v59 = vadd.f32 %v4242_v51, %v5635_v48 }
 0x1f4   : > { %v4006_v3 = vpop.f32.mrb[20].mxu1  ;;  %3097 = vst.msk [vmem:[%s5643_s16 + $0x88] sm:$0xff] %vm3079_vm4, %v3064_v58  ;;  %v3063_v7 = vsel %vm2999_vm6, %v2967_v43, %v3031_v9  ;;  %v2969_v8 = vadd.f32 %v4243_v6, %v5635_v48  ;;  %v4206_v22 = vpop.f32.mrb[20].mxu0 }
 0x1f5   : > { %v1783_v28 = vpop.f32.mrb[21].mxu1  ;;  %3096 = vst.msk [vmem:[%s5643_s16 + $0x80] sm:$0xff] %vm3079_vm4, %v3063_v7  ;;  %vm3002_vm7 = vcmp.ge.f32.partialorder %v2970_v59, 0.0  ;;  %v3034_v29 = vmul.f32 0.1, %v2970_v59  ;;  %v4244_v53 = vadd.f32 %v4206_v22, %v4006_v3  ;;  %v2853_v55 = vpop.f32.mrb[21].mxu0 }
 0x1f6   : > { %vm3001_vm8 = vcmp.ge.f32.partialorder %v2969_v8, 0.0  ;;  %v3033_v21 = vmul.f32 0.1, %v2969_v8  ;;  %v4245_v24 = vadd.f32 %v2853_v55, %v1783_v28 }
 0x1f7   : > { %v3066_v10 = vsel %vm3002_vm7, %v2970_v59, %v3034_v29  ;;  %v2972_v12 = vadd.f32 %v4244_v53, %v5635_v48 }
 0x1f8   : > { %v4009_v40 = vpop.f32.mrb[22].mxu1  ;;  %3099 = vst.msk [vmem:[%s5643_s16 + $0x98] sm:$0xff] %vm3079_vm4, %v3066_v10  ;;  %v3065_v20 = vsel %vm3001_vm8, %v2969_v8, %v3033_v21  ;;  %v2971_v54 = vadd.f32 %v4245_v24, %v5635_v48  ;;  %v4209_v19 = vpop.f32.mrb[22].mxu0 }
 0x1f9   : > { %v1793_v13 = vpop.f32.mrb[23].mxu1  ;;  %3098 = vst.msk [vmem:[%s5643_s16 + $0x90] sm:$0xff] %vm3079_vm4, %v3065_v20  ;;  %vm3004_vm9 = vcmp.ge.f32.partialorder %v2972_v12, 0.0  ;;  %v3036_v39 = vmul.f32 0.1, %v2972_v12  ;;  %v4246_v41 = vadd.f32 %v4209_v19, %v4009_v40  ;;  %v2863_v17 = vpop.f32.mrb[23].mxu0 }
 0x1fa   : > { %vm3003_vm10 = vcmp.ge.f32.partialorder %v2971_v54, 0.0  ;;  %v3035_v61 = vmul.f32 0.1, %v2971_v54  ;;  %v4247_v45 = vadd.f32 %v2863_v17, %v1793_v13 }
 0x1fb   : > { %v3068_v0 = vsel %vm3004_vm9, %v2972_v12, %v3036_v39  ;;  %v2974_v33 = vadd.f32 %v4246_v41, %v5635_v48 }
 0x1fc   : > { %v4012_v5 = vpop.f32.mrb[24].mxu1  ;;  %3101 = vst.msk [vmem:[%s5643_s16 + $0xa8] sm:$0xff] %vm3079_vm4, %v3068_v0  ;;  %v3067_v16 = vsel %vm3003_vm10, %v2971_v54, %v3035_v61  ;;  %v2973_v11 = vadd.f32 %v4247_v45, %v5635_v48  ;;  %v4212_v47 = vpop.f32.mrb[24].mxu0 }
 0x1fd   : > { %v1803_v63 = vpop.f32.mrb[25].mxu1  ;;  %3100 = vst.msk [vmem:[%s5643_s16 + $0xa0] sm:$0xff] %vm3079_vm4, %v3067_v16  ;;  %vm3006_vm11 = vcmp.ge.f32.partialorder %v2974_v33, 0.0  ;;  %v3038_v23 = vmul.f32 0.1, %v2974_v33  ;;  %v4248_v57 = vadd.f32 %v4212_v47, %v4012_v5  ;;  %v2873_v30 = vpop.f32.mrb[25].mxu0 }
 0x1fe   : > { %vm3005_vm12 = vcmp.ge.f32.partialorder %v2973_v11, 0.0  ;;  %v3037_v49 = vmul.f32 0.1, %v2973_v11  ;;  %v4249_v38 = vadd.f32 %v2873_v30, %v1803_v63 }
 0x1ff   : > { %v3070_v37 = vsel %vm3006_vm11, %v2974_v33, %v3038_v23  ;;  %v2976_v56 = vadd.f32 %v4248_v57, %v5635_v48 }
 0x200   : > { %v4015_v62 = vpop.f32.mrb[26].mxu1  ;;  %3103 = vst.msk [vmem:[%s5643_s16 + $0xb8] sm:$0xff] %vm3079_vm4, %v3070_v37  ;;  %v3069_v4 = vsel %vm3005_vm12, %v2973_v11, %v3037_v49  ;;  %v2975_v35 = vadd.f32 %v4249_v38, %v5635_v48  ;;  %v4215_v44 = vpop.f32.mrb[26].mxu0 }
 0x201   : > { %v1813_v27 = vpop.f32.mrb[27].mxu1  ;;  %3102 = vst.msk [vmem:[%s5643_s16 + $0xb0] sm:$0xff] %vm3079_vm4, %v3069_v4  ;;  %vm3008_vm13 = vcmp.ge.f32.partialorder %v2976_v56, 0.0  ;;  %v3040_v2 = vmul.f32 0.1, %v2976_v56  ;;  %v4250_v34 = vadd.f32 %v4215_v44, %v4015_v62  ;;  %v2883_v60 = vpop.f32.mrb[27].mxu0 }
 0x202   : > { %vm3007_vm14 = vcmp.ge.f32.partialorder %v2975_v35, 0.0  ;;  %v3039_v14 = vmul.f32 0.1, %v2975_v35  ;;  %v4251_v1 = vadd.f32 %v2883_v60, %v1813_v27 }
 0x203   : > { %v3072_v15 = vsel %vm3008_vm13, %v2976_v56, %v3040_v2  ;;  %v2978_v36 = vadd.f32 %v4250_v34, %v5635_v48 }
 0x204   : > { %v4018_v18 = vpop.f32.mrb[28].mxu1  ;;  %3105 = vst.msk [vmem:[%s5643_s16 + $0xc8] sm:$0xff] %vm3079_vm4, %v3072_v15  ;;  %v3071_v25 = vsel %vm3007_vm14, %v2975_v35, %v3039_v14  ;;  %v2977_v31 = vadd.f32 %v4251_v1, %v5635_v48  ;;  %v4218_v32 = vpop.f32.mrb[28].mxu0 }
 0x205   : > { %v1823_v42 = vpop.f32.mrb[29].mxu1  ;;  %3104 = vst.msk [vmem:[%s5643_s16 + $0xc0] sm:$0xff] %vm3079_vm4, %v3071_v25  ;;  %vm3010_vm15 = vcmp.ge.f32.partialorder %v2978_v36, 0.0  ;;  %v3042_v43 = vmul.f32 0.1, %v2978_v36  ;;  %v4252_v50 = vadd.f32 %v4218_v32, %v4018_v18  ;;  %v2893_v52 = vpop.f32.mrb[29].mxu0 }
 0x206   : > { %vm3009_vm0 = vcmp.ge.f32.partialorder %v2977_v31, 0.0  ;;  %v3041_v26 = vmul.f32 0.1, %v2977_v31  ;;  %v4253_v51 = vadd.f32 %v2893_v52, %v1823_v42 }
 0x207   : > { %v3074_v46 = vsel %vm3010_vm15, %v2978_v36, %v3042_v43  ;;  %v2980_v9 = vadd.f32 %v4252_v50, %v5635_v48 }
 0x208   : > { %v4021_v6 = vpop.f32.mrb[30].mxu1  ;;  %3107 = vst.msk [vmem:[%s5643_s16 + $0xd8] sm:$0xff] %vm3079_vm4, %v3074_v46  ;;  %v3073_v58 = vsel %vm3009_vm0, %v2977_v31, %v3041_v26  ;;  %v2979_v59 = vadd.f32 %v4253_v51, %v5635_v48  ;;  %v4221_v3 = vpop.f32.mrb[30].mxu0 }
 0x209   : > { %v1833_v7 = vpop.f32.mrb[31].mxu1  ;;  %3106 = vst.msk [vmem:[%s5643_s16 + $0xd0] sm:$0xff] %vm3079_vm4, %v3073_v58  ;;  %vm3012_vm1 = vcmp.ge.f32.partialorder %v2980_v9, 0.0  ;;  %v3044_v8 = vmul.f32 0.1, %v2980_v9  ;;  %v4254_v22 = vadd.f32 %v4221_v3, %v4021_v6  ;;  %v2903_v28 = vpop.f32.mrb[31].mxu0 }
 0x20a   : > { %vm3011_vm2 = vcmp.ge.f32.partialorder %v2979_v59, 0.0  ;;  %v3043_v29 = vmul.f32 0.1, %v2979_v59  ;;  %v4255_v53 = vadd.f32 %v2903_v28, %v1833_v7 }
 0x20b   : > { %v3076_v55 = vsel %vm3012_vm1, %v2980_v9, %v3044_v8  ;;  %v2982_v21 = vadd.f32 %v4254_v22, %v5635_v48 }
 0x20c   : > { %3109 = vst.msk [vmem:[%s5643_s16 + $0xe8] sm:$0xff] %vm3079_vm4, %v3076_v55  ;;  %v3075_v24 = vsel %vm3011_vm2, %v2979_v59, %v3043_v29  ;;  %v2981_v10 = vadd.f32 %v4255_v53, %v5635_v48 }
 0x20d   : > { %3108 = vst.msk [vmem:[%s5643_s16 + $0xe0] sm:$0xff] %vm3079_vm4, %v3075_v24  ;;  %vm3014_vm3 = vcmp.ge.f32.partialorder %v2982_v21, 0.0  ;;  %v3046_v12 = vmul.f32 0.1, %v2982_v21 }
 0x20e   : > { %vm3013_vm5 = vcmp.ge.f32.partialorder %v2981_v10, 0.0  ;;  %v3045_v40 = vmul.f32 0.1, %v2981_v10 }
 0x20f   : > { %v3078_v20 = vsel %vm3014_vm3, %v2982_v21, %v3046_v12 }
 0x210   : > { %3111 = vst.msk [vmem:[%s5643_s16 + $0xf8] sm:$0xff] %vm3079_vm4, %v3078_v20  ;;  %v3077_v54 = vsel %vm3013_vm5, %v2981_v10, %v3045_v40 }
 0x211   : > { %3110 = vst.msk [vmem:[%s5643_s16 + $0xf0] sm:$0xff] %vm3079_vm4, %v3077_v54 }
 0x212 PF: > { %s13_s12 = sadd.s32 1, %s4495_s12  }
 0x213   : > { %p10_p4 = scmp.ge.s32.totalorder %s13_s12, 4  }
 0x215   :  { %12 = sbr.rel (!%p10_p4) target bundleno = 1 (0x1), region = 70 }

</bundles_post_ra>
